<compile_context>
chip_gen: v6e
topology: v6e:2x2x1
jax: 0.10.0
libtpu: 0.0.40
codegen_flags: <defaults>
</compile_context>

<pallas_src>
import functools

import jax
import jax.numpy as jnp
from jax.experimental import pallas as pl
from jax.experimental.pallas import tpu as pltpu

HIDDEN = 2048  # fixed inner width from the nn.Sequential definition


def _round_up(n, m):
    return ((n + m - 1) // m) * m


def _spec(block_shape, index_map, buffers=None):
    """BlockSpec helper: optionally request an explicit pipeline depth.

    Buffered(1) on constant-index blocks avoids double-buffering weights that
    never change; falls back to a plain BlockSpec if this JAX version does not
    accept pipeline_mode (still correct, just uses more VMEM).
    """
    if buffers is not None:
        try:
            return pl.BlockSpec(block_shape, index_map,
                                pipeline_mode=pl.Buffered(buffers))
        except Exception:  # pragma: no cover - older JAX without pipeline_mode
            pass
    return pl.BlockSpec(block_shape, index_map)


@functools.lru_cache(maxsize=1)
def _vmem_capacity_bytes():
    """Physical per-core VMEM; conservative 64 MiB (v7x) if the query fails."""
    try:
        return int(pltpu.get_tpu_info().vmem_capacity_bytes)
    except Exception:
        return 64 << 20


def _vmem_limit(footprint, cap):
    # Tight limit: actual footprint + headroom for compiler-internal scratch,
    # never above physical VMEM, never below the default scoped limit.
    return int(min(max(footprint + (8 << 20), 32 << 20), cap))


# --------------------------------------------------------------------------
# Kernels
# --------------------------------------------------------------------------
def _projector_kernel_resident(x_ref, w1_ref, b1_ref, w2_ref, b2_ref, o_ref):
    # x_ref:  (tm, d_in_p)        bf16 token tile
    # w1_ref: (d_in_p, HIDDEN)    bf16, resident (single buffer)
    # b1_ref: (1, HIDDEN)         f32
    # w2_ref: (HIDDEN, d_out_p)   bf16, resident (single buffer)
    # b2_ref: (1, d_out_p)        f32
    # o_ref:  (tm, d_out_p)       output tile
    h = jnp.dot(x_ref[...], w1_ref[...], preferred_element_type=jnp.float32)
    h = jnp.maximum(h + b1_ref[...], 0.0).astype(jnp.bfloat16)
    y = jnp.dot(h, w2_ref[...], preferred_element_type=jnp.float32)
    o_ref[...] = (y + b2_ref[...]).astype(o_ref.dtype)


def _projector_kernel_tiled(x_ref, w1_ref, b1_ref, w2_ref, b2_ref, o_ref,
                            h_ref):
    # Fallback when w2 cannot be fully resident: grid = (M tiles, d_out tiles).
    # h = ReLU(x@w1+b1) is computed once per M tile (j == 0) and reused from a
    # bf16 VMEM scratch for every d_out tile.
    #
    # INVARIANT: j (axis 1) must remain the innermost *sequential* grid axis
    # ("arbitrary") and i the only "parallel" axis; otherwise h_ref would be
    # read stale. Do not reorder the grid or mark j parallel.
    @pl.when(pl.program_id(1) == 0)
    def _():
        h = jnp.dot(x_ref[...], w1_ref[...], preferred_element_type=jnp.float32)
        h_ref[...] = jnp.maximum(h + b1_ref[...], 0.0).astype(h_ref.dtype)

    y = jnp.dot(h_ref[...], w2_ref[...], preferred_element_type=jnp.float32)
    o_ref[...] = (y + b2_ref[...]).astype(o_ref.dtype)


# --------------------------------------------------------------------------
# VMEM footprint estimates (match the BlockSpec buffer counts above)
# --------------------------------------------------------------------------
def _resident_footprint(tm, d_in_p, d_out_p, out_itemsize):
    b = 0
    b += 2 * tm * d_in_p * 2                # x tile (bf16), double-buffered
    b += d_in_p * HIDDEN * 2                # w1 (bf16), single buffer
    b += 8 * HIDDEN * 4                     # b1 (f32, sublane-padded)
    b += HIDDEN * d_out_p * 2               # w2 (bf16), single buffer
    b += 8 * d_out_p * 4                    # b2 (f32, sublane-padded)
    b += 2 * tm * d_out_p * out_itemsize    # out tile, double-buffered
    return b


def _tiled_footprint(tm, d_in_p, tn, out_itemsize):
    b = 0
    b += 2 * tm * d_in_p * 2                # x tile
    b += d_in_p * HIDDEN * 2                # w1, single buffer
    b += 8 * HIDDEN * 4                     # b1
    b += 3 * HIDDEN * tn * 2                # w2 slice, Buffered(3)
    b += 3 * 8 * tn * 4                     # b2 slice, Buffered(3)
    b += 2 * tm * tn * out_itemsize         # out tile
    b += tm * HIDDEN * 2                    # h scratch (bf16)
    return b


# --------------------------------------------------------------------------
# Parameter prep (run ONCE at load time, not per forward call)
# --------------------------------------------------------------------------
def prepare_projector_params(w1, b1, w2, b2):
    """Cast weights to bf16 / biases to f32 and pad feature dims to 128."""
    d_in = w1.shape[0]
    d_out = w2.shape[1]
    d_in_pad = _round_up(d_in, 128)
    d_out_pad = _round_up(d_out, 128)
    w1p = jnp.pad(w1.astype(jnp.bfloat16), ((0, d_in_pad - d_in), (0, 0)))
    b1p = b1.reshape(1, -1).astype(jnp.float32)
    w2p = jnp.pad(w2.astype(jnp.bfloat16), ((0, 0), (0, d_out_pad - d_out)))
    b2p = jnp.pad(b2.reshape(1, -1).astype(jnp.float32),
                  ((0, 0), (0, d_out_pad - d_out)))
    return {"w1": w1p, "b1": b1p, "w2": w2p, "b2": b2p}


# --------------------------------------------------------------------------
# Forward
# --------------------------------------------------------------------------
@functools.partial(jax.jit, static_argnames=("d_out", "tm", "tn", "out_dtype"))
def projector_forward(x, params, d_out, *, tm=512, tn=512, out_dtype=None):
    """x: (batch, seq, d_in) -> (batch, seq, d_out). Fused MLP in one Pallas kernel."""
    batch, seq, d_in = x.shape
    w1p, b1p, w2p, b2p = params["w1"], params["b1"], params["w2"], params["b2"]
    d_in_pad = w1p.shape[0]
    d_out_pad = w2p.shape[1]
    if out_dtype is None:
        out_dtype = x.dtype
    out_itemsize = jnp.dtype(out_dtype).itemsize

    m = batch * seq
    # Clamp tm to multiples of 16 (bf16 sublane packing); for short inputs
    # split into >= 2 M tiles so the 'parallel' axis can use both v7x cores.
    tm_eff = min(tm, _round_up(m, 16))
    if _round_up(m, tm_eff) // tm_eff < 2 and m > 16:
        tm_eff = max(16, _round_up((m + 1) // 2, 16))
    m_pad = _round_up(m, tm_eff)

    # Only the activation is cast/padded per call; weights were prepped once.
    x2 = x.reshape(m, d_in).astype(jnp.bfloat16)
    x2 = jnp.pad(x2, ((0, m_pad - m), (0, d_in_pad - d_in)))

    cap = _vmem_capacity_bytes()
    budget = cap - (16 << 20)   # leave headroom for compiler scratch

    resident_fp = _resident_footprint(tm_eff, d_in_pad, d_out_pad, out_itemsize)

    if resident_fp <= budget:
        # ---- Main path: w1 and w2 fully resident, single grid axis over M ----
        grid = (m_pad // tm_eff,)
        out = pl.pallas_call(
            _projector_kernel_resident,
            out_shape=jax.ShapeDtypeStruct((m_pad, d_out_pad), out_dtype),
            grid_spec=pltpu.PrefetchScalarGridSpec(
                num_scalar_prefetch=0,
                grid=grid,
                in_specs=[
                    pl.BlockSpec((tm_eff, d_in_pad), lambda i: (i, 0)),      # x tile
                    _spec((d_in_pad, HIDDEN), lambda i: (0, 0), buffers=1),  # w1
                    _spec((1, HIDDEN), lambda i: (0, 0), buffers=1),         # b1
                    _spec((HIDDEN, d_out_pad), lambda i: (0, 0), buffers=1), # w2
                    _spec((1, d_out_pad), lambda i: (0, 0), buffers=1),      # b2
                ],
                out_specs=pl.BlockSpec((tm_eff, d_out_pad), lambda i: (i, 0)),
            ),
            compiler_params=pltpu.CompilerParams(
                dimension_semantics=("parallel",),
                vmem_limit_bytes=_vmem_limit(resident_fp, cap),
            ),
        )(x2, w1p, b1p, w2p, b2p)
    else:
        # ---- Fallback: tile d_out; h scratch reused across d_out tiles ----
        tn_eff = min(tn, d_out_pad)
        while d_out_pad % tn_eff != 0:   # d_out_pad is a multiple of 128
            tn_eff -= 128
        tiled_fp = _tiled_footprint(tm_eff, d_in_pad, tn_eff, out_itemsize)
        grid = (m_pad // tm_eff, d_out_pad // tn_eff)
        out = pl.pallas_call(
            _projector_kernel_tiled,
            out_shape=jax.ShapeDtypeStruct((m_pad, d_out_pad), out_dtype),
            grid_spec=pltpu.PrefetchScalarGridSpec(
                num_scalar_prefetch=0,
                grid=grid,
                in_specs=[
                    pl.BlockSpec((tm_eff, d_in_pad), lambda i, j: (i, 0)),      # x tile
                    _spec((d_in_pad, HIDDEN), lambda i, j: (0, 0), buffers=1),  # w1
                    _spec((1, HIDDEN), lambda i, j: (0, 0), buffers=1),         # b1
                    _spec((HIDDEN, tn_eff), lambda i, j: (0, j), buffers=3),    # w2 slice
                    _spec((1, tn_eff), lambda i, j: (0, j), buffers=3),         # b2 slice
                ],
                out_specs=pl.BlockSpec((tm_eff, tn_eff), lambda i, j: (i, j)),
                scratch_shapes=[pltpu.VMEM((tm_eff, HIDDEN), jnp.bfloat16)],
            ),
            compiler_params=pltpu.CompilerParams(
                # j MUST stay sequential ("arbitrary"): h scratch from j==0 is
                # reused across all j of the same i.
                dimension_semantics=("parallel", "arbitrary"),
                vmem_limit_bytes=_vmem_limit(tiled_fp, cap),
            ),
        )(x2, w1p, b1p, w2p, b2p)

    return out[:m, :d_out].reshape(batch, seq, d_out)


# --------------------------------------------------------------------------
# Init + self-test
# --------------------------------------------------------------------------
def init_projector_params(key, speech_encoder_hidden_size, llm_hidden_size,
                          dtype=jnp.float32):
    """Deterministic init mimicking nn.Linear's uniform(-1/sqrt(fan_in), 1/sqrt(fan_in))."""
    k1, k2, k3, k4 = jax.random.split(key, 4)
    bound1 = 1.0 / jnp.sqrt(speech_encoder_hidden_size)
    bound2 = 1.0 / jnp.sqrt(HIDDEN)
    # Stored as (in_features, out_features) == transpose of torch's weight layout.
    w1 = jax.random.uniform(k1, (speech_encoder_hidden_size, HIDDEN),
                            dtype, -bound1, bound1)
    b1 = jax.random.uniform(k2, (1, HIDDEN), dtype, -bound1, bound1)
    w2 = jax.random.uniform(k3, (HIDDEN, llm_hidden_size),
                            dtype, -bound2, bound2)
    b2 = jax.random.uniform(k4, (1, llm_hidden_size), dtype, -bound2, bound2)
    return w1, b1, w2, b2


def _reference(x, w1, b1, w2, b2):
    """Pure-JAX reference mirroring the kernel's bf16-weight / f32-acc numerics."""
    d_in = x.shape[-1]
    xb = x.reshape(-1, d_in).astype(jnp.bfloat16)
    h = jnp.maximum(
        jnp.dot(xb, w1.astype(jnp.bfloat16),
                preferred_element_type=jnp.float32) + b1, 0.0)
    y = jnp.dot(h.astype(jnp.bfloat16), w2.astype(jnp.bfloat16),
                preferred_element_type=jnp.float32) + b2
    return y.reshape(x.shape[:-1] + (w2.shape[1],)).astype(x.dtype)


if __name__ == "__main__":
    key = jax.random.PRNGKey(0)
    k_params, k_x1, k_x2 = jax.random.split(key, 3)

    speech_encoder_hidden_size = 32
    llm_hidden_size = 32

    w1, b1, w2, b2 = init_projector_params(
        k_params, speech_encoder_hidden_size, llm_hidden_size)
    params = prepare_projector_params(w1, b1, w2, b2)  # one-time prep

    # Case 1: tiny (single M tile).
    x1 = jax.random.normal(k_x1, (2, 8, speech_encoder_hidden_size),
                           dtype=jnp.float32)
    out1 = jax.block_until_ready(
        projector_forward(x1, params, d_out=llm_hidden_size))
    ref1 = _reference(x1, w1, b1, w2, b2)
    assert out1.shape == (2, 8, llm_hidden_size)
    assert jnp.allclose(out1, ref1, atol=1e-2, rtol=1e-2), \
        float(jnp.max(jnp.abs(out1 - ref1)))

    # Case 2: odd token count (exercises M padding + 2-tile parallel grid).
    x2 = jax.random.normal(k_x2, (3, 17, speech_encoder_hidden_size),
                           dtype=jnp.float32)
    out2 = jax.block_until_ready(
        projector_forward(x2, params, d_out=llm_hidden_size))
    ref2 = _reference(x2, w1, b1, w2, b2)
    assert out2.shape == (3, 17, llm_hidden_size)
    assert jnp.allclose(out2, ref2, atol=1e-2, rtol=1e-2), \
        float(jnp.max(jnp.abs(out2 - ref2)))

    print("KERNEL_OK")
</pallas_src>

<mosaic_0001>
module attributes {stable_mosaic.version = 11 : i64} {
  func.func @_projector_kernel_resident(%arg0: i32, %arg1: memref<16x128xbf16, #tpu.memory_space<vmem>>, %arg2: memref<128x2048xbf16, #tpu.memory_space<vmem>>, %arg3: memref<1x2048xf32, #tpu.memory_space<vmem>>, %arg4: memref<2048x128xbf16, #tpu.memory_space<vmem>>, %arg5: memref<1x128xf32, #tpu.memory_space<vmem>>, %arg6: memref<16x128xf32, #tpu.memory_space<vmem>>) attributes {dimension_semantics = [#tpu.dimension_semantics<parallel>], iteration_bounds = array<i64: 1>, scalar_prefetch = 0 : i64, scratch_operands = 0 : i64, tpu.core_type = #tpu.core_type<tc>, window_params = [{transform_indices = @transform_0, window_bounds = array<i64: 16, 128>}, {pipeline_mode = #tpu.pipeline_mode<synchronous>, transform_indices = @transform_1, window_bounds = array<i64: 128, 2048>}, {pipeline_mode = #tpu.pipeline_mode<synchronous>, transform_indices = @transform_2, window_bounds = array<i64: 1, 2048>}, {pipeline_mode = #tpu.pipeline_mode<synchronous>, transform_indices = @transform_3, window_bounds = array<i64: 2048, 128>}, {pipeline_mode = #tpu.pipeline_mode<synchronous>, transform_indices = @transform_4, window_bounds = array<i64: 1, 128>}, {transform_indices = @transform_5, window_bounds = array<i64: 16, 128>}]} {
    %c0 = arith.constant 0 : index
    %c0_0 = arith.constant 0 : index
    %0 = vector.load %arg1[%c0, %c0_0] : memref<16x128xbf16, #tpu.memory_space<vmem>>, vector<16x128xbf16>
    %c0_1 = arith.constant 0 : index
    %c0_2 = arith.constant 0 : index
    %1 = vector.load %arg2[%c0_1, %c0_2] : memref<128x2048xbf16, #tpu.memory_space<vmem>>, vector<128x2048xbf16>
    %cst = arith.constant dense<0.000000e+00> : vector<16x2048xf32>
    %2 = tpu.matmul %0, %1, %cst {dimension_numbers = #tpu.dot_dimension_numbers<[1], [0], [0], [1], [0, 0, 1, 1], [], []>} : vector<16x128xbf16>, vector<128x2048xbf16>, vector<16x2048xf32> -> vector<16x2048xf32>
    %c0_3 = arith.constant 0 : index
    %c0_4 = arith.constant 0 : index
    %3 = vector.load %arg3[%c0_3, %c0_4] : memref<1x2048xf32, #tpu.memory_space<vmem>>, vector<1x2048xf32>
    %4 = vector.broadcast %3 : vector<1x2048xf32> to vector<16x2048xf32>
    %5 = arith.addf %2, %4 : vector<16x2048xf32>
    %cst_5 = arith.constant 0.000000e+00 : f32
    %6 = vector.broadcast %cst_5 : f32 to vector<16x2048xf32>
    %7 = arith.maximumf %5, %6 : vector<16x2048xf32>
    %8 = arith.truncf %7 : vector<16x2048xf32> to vector<16x2048xbf16>
    %c0_6 = arith.constant 0 : index
    %c0_7 = arith.constant 0 : index
    %9 = vector.load %arg4[%c0_6, %c0_7] : memref<2048x128xbf16, #tpu.memory_space<vmem>>, vector<2048x128xbf16>
    %cst_8 = arith.constant dense<0.000000e+00> : vector<16x128xf32>
    %10 = tpu.matmul %8, %9, %cst_8 {dimension_numbers = #tpu.dot_dimension_numbers<[1], [0], [0], [1], [0, 0, 1, 1], [], []>} : vector<16x2048xbf16>, vector<2048x128xbf16>, vector<16x128xf32> -> vector<16x128xf32>
    %c0_9 = arith.constant 0 : index
    %c0_10 = arith.constant 0 : index
    %11 = vector.load %arg5[%c0_9, %c0_10] : memref<1x128xf32, #tpu.memory_space<vmem>>, vector<1x128xf32>
    %12 = vector.broadcast %11 : vector<1x128xf32> to vector<16x128xf32>
    %13 = arith.addf %10, %12 : vector<16x128xf32>
    %c0_11 = arith.constant 0 : index
    %c0_12 = arith.constant 0 : index
    %14 = vector.load %arg6[%c0_11, %c0_12] : memref<16x128xf32, #tpu.memory_space<vmem>>, vector<16x128xf32>
    tpu.vector_store %arg6[%c0_11, %c0_12], %13 {strides = array<i32>} : memref<16x128xf32, #tpu.memory_space<vmem>>, vector<16x128xf32>,
    return
  }
  func.func @transform_0(%arg0: i32) -> (i32, i32) {
    %c0_i32 = arith.constant 0 : i32
    %c0_i32_0 = arith.constant 0 : i32
    return %arg0, %c0_i32 : i32, i32
  }
  func.func @transform_1(%arg0: i32) -> (i32, i32) {
    %c0_i32 = arith.constant 0 : i32
    %c0_i32_0 = arith.constant 0 : i32
    %c0_i32_1 = arith.constant 0 : i32
    return %c0_i32, %c0_i32_0 : i32, i32
  }
  func.func @transform_2(%arg0: i32) -> (i32, i32) {
    %c0_i32 = arith.constant 0 : i32
    %c0_i32_0 = arith.constant 0 : i32
    %c0_i32_1 = arith.constant 0 : i32
    return %c0_i32, %c0_i32_0 : i32, i32
  }
  func.func @transform_3(%arg0: i32) -> (i32, i32) {
    %c0_i32 = arith.constant 0 : i32
    %c0_i32_0 = arith.constant 0 : i32
    %c0_i32_1 = arith.constant 0 : i32
    return %c0_i32, %c0_i32_0 : i32, i32
  }
  func.func @transform_4(%arg0: i32) -> (i32, i32) {
    %c0_i32 = arith.constant 0 : i32
    %c0_i32_0 = arith.constant 0 : i32
    %c0_i32_1 = arith.constant 0 : i32
    return %c0_i32, %c0_i32_0 : i32, i32
  }
  func.func @transform_5(%arg0: i32) -> (i32, i32) {
    %c0_i32 = arith.constant 0 : i32
    %c0_i32_0 = arith.constant 0 : i32
    return %arg0, %c0_i32 : i32, i32
  }
}

</mosaic_0001>

<bundles_post_ra>
// kernel: projector_forward.1
= control target key start
LH: loop header
LB: loop body
LE: loop exit
PB: predicated region body
PF: predicated region fallthrough
CT: control target
= control target key end

     0   :  { %10 = vsyncpa [#allocation3], 0  ;;  %s3424_s0 = inlined_call_operand.vmem [shape: bf16[16,128], index: 0, kind: input, shape index: {}]   ;;  %s3425_s1 = inlined_call_operand.hbm [shape: bf16[128,2048], index: 1, kind: input, shape index: {}]   ;;  %s3426_s2 = inlined_call_operand.vmem [shape: f32[1,2048], index: 2, kind: input, shape index: {}]   ;;  %s3427_s3 = inlined_call_operand.hbm [shape: bf16[2048,128], index: 3, kind: input, shape index: {}]   ;;  %s3428_s4 = inlined_call_operand.vmem [shape: f32[1,128], index: 4, kind: input, shape index: {}]   ;;  %s3429_s5 = inlined_call_operand.vmem [shape: f32[16,128], index: 5, kind: output, shape index: {}]  }
   0x1   :  { %11 = vsyncpa [#allocation5], 0  ;;  %s3282_s18 = smov [#allocation2]  }
   0x2   :  { %s19_s19 = sshll.u32 %s3282_s18, 4  ;;  %s20_s19 = int_to_ptr.vmem [resolvable:$true] %s19_s19 }
   0x3   :  { %s3246_s20 = scalar_lea.vmem %s20_s19, 16384  ;;  %p3251_p1 = scmp.lt.s32.totalorder %s20_s19, %s20_s19 }
   0x4   :  { %p3247_p0 = scmp.ne.s32.totalorder %s20_s19, %s3246_s20  ;;  %p3252_p2 = scmp.lt.s32.totalorder %s3246_s20, %s3246_s20 }
   0x6   :  { %p3253_p3 = por %p3252_p2, %p3251_p1 }
   0x8   :  { %p3254_p4 = pnand %p3253_p3, %p3247_p0 }
   0xa   :  { %3257 = shalt.err (!%p3254_p4)
}
   0xb   :  { %s3283_s21 = smov 1024   ;;  %s3284_s22 = smov 64  }
   0xc   :  { %25 = dma.hbm_to_vmem [thread:$0]  %s3425_s1, 16384, %s20_s19, [#allocation3], %s3283_s21, %s3283_s21, %s3284_s22  }
   0xd   :  { %s3285_s25 = smov [#allocation4]  }
   0xe   :  { %s33_s26 = sshll.u32 %s3285_s25, 4  ;;  %s34_s26 = int_to_ptr.vmem [resolvable:$true] %s33_s26 }
   0xf   :  { %s3266_s27 = scalar_lea.vmem %s34_s26, 16384  ;;  %p3271_p6 = scmp.lt.s32.totalorder %s34_s26, %s34_s26 }
  0x10   :  { %p3267_p5 = scmp.ne.s32.totalorder %s34_s26, %s3266_s27  ;;  %p3272_p7 = scmp.lt.s32.totalorder %s3266_s27, %s3266_s27 }
  0x12   :  { %p3273_p8 = por %p3272_p7, %p3271_p6 }
  0x14   :  { %p3274_p9 = pnand %p3273_p8, %p3267_p5 }
  0x16   :  { %3277 = shalt.err (!%p3274_p9)
}
  0x17   :  { %s3286_s28 = smov 4  }
  0x18   :  { %39 = dma.hbm_to_vmem [thread:$0]  %s3427_s3, 16384, %s34_s26, [#allocation5], %s3284_s22, %s3284_s22, %s3286_s28  }
  0x19   :  { %3278 = dma.done.wait [#allocation3], 16384  }
  0x1a   :  { %3279 = vsyncadd [#allocation3], 4294950912 }
  0x1b   :  { %3280 = dma.done.wait [#allocation5], 16384  }
  0x1c   :  { %3281 = vsyncadd [#allocation5], 4294950912  ;;  %v3287_v0 = vmov 0   ;;  %v163_v1 = vld [vmem:[#allocation2 + $0x380] sm:$0xff]  ;;  %v164_v3 = vld [vmem:[#allocation2 + $0x388] sm:$0xff] }
  0x1d   :  { %941 = vmatprep.mubr.bf16.mxu0 %v3287_v0  ;;  %984 = vmatprep.mubr.bf16.mxu1 %v3287_v0  ;;  %v171_v2 = vld [vmem:[#allocation2 + $0x3c0] sm:$0xff]  ;;  %v172_v5 = vld [vmem:[#allocation2 + $0x3c8] sm:$0xff]  ;;  %v165_v63 = vld [vmem:[#allocation2 + $0x390] sm:$0xff] }
  0x1e   :  { %v2782_v4 = vcombine.high %v163_v1, %v171_v2  ;;  %v2781_v6 = vcombine.low %v163_v1, %v171_v2  ;;  %v147_v7 = vld [vmem:[#allocation2 + $0x300] sm:$0xff]  ;;  %v2784_v9 = vcombine.high %v164_v3, %v172_v5  ;;  %v2783_v10 = vcombine.low %v164_v3, %v172_v5  ;;  %v148_v12 = vld [vmem:[#allocation2 + $0x308] sm:$0xff]  ;;  %v173_v1 = vld [vmem:[#allocation2 + $0x3d0] sm:$0xff] }
  0x1f   :  { %v155_v8 = vld [vmem:[#allocation2 + $0x340] sm:$0xff]  ;;  %v156_v13 = vld [vmem:[#allocation2 + $0x348] sm:$0xff]  ;;  %v166_v2 = vld [vmem:[#allocation2 + $0x398] sm:$0xff] }
  0x20   :  { %v2766_v11 = vcombine.high %v147_v7, %v155_v8  ;;  %v131_v14 = vld [vmem:[#allocation2 + $0x280] sm:$0xff]  ;;  %909 = vmatprep.subr.bf16.mxu0 %v2782_v4  ;;  %v2768_v15 = vcombine.high %v148_v12, %v156_v13  ;;  %v132_v17 = vld [vmem:[#allocation2 + $0x288] sm:$0xff]  ;;  %952 = vmatprep.subr.bf16.mxu1 %v2784_v9  ;;  %v2765_v19 = vcombine.low %v147_v7, %v155_v8  ;;  %v174_v3 = vld [vmem:[#allocation2 + $0x3d8] sm:$0xff] }
  0x21   :  { %v139_v16 = vld [vmem:[#allocation2 + $0x2c0] sm:$0xff]  ;;  %v140_v18 = vld [vmem:[#allocation2 + $0x2c8] sm:$0xff]  ;;  %910 = vmatpush1.bf16.msra.mxu0 %v2781_v6  ;;  %953 = vmatpush1.bf16.msra.mxu1 %v2783_v10  ;;  %v2767_v20 = vcombine.low %v148_v12, %v156_v13  ;;  %v2786_v6 = vcombine.high %v165_v63, %v173_v1  ;;  %v2788_v7 = vcombine.high %v166_v2, %v174_v3  ;;  %v149_v8 = vld [vmem:[#allocation2 + $0x310] sm:$0xff] }
  0x22   :  { %911 = vmatprep.subr.bf16.mxu0 %v2766_v11  ;;  %v2750_v21 = vcombine.high %v131_v14, %v139_v16  ;;  %954 = vmatprep.subr.bf16.mxu1 %v2768_v15  ;;  %v2752_v22 = vcombine.high %v132_v17, %v140_v18  ;;  %v115_v23 = vld [vmem:[#allocation2 + $0x200] sm:$0xff]  ;;  %v116_v25 = vld [vmem:[#allocation2 + $0x208] sm:$0xff]  ;;  %v2749_v27 = vcombine.low %v131_v14, %v139_v16  ;;  %v157_v9 = vld [vmem:[#allocation2 + $0x350] sm:$0xff] }
  0x23   :  { %v123_v24 = vld [vmem:[#allocation2 + $0x240] sm:$0xff]  ;;  %v124_v26 = vld [vmem:[#allocation2 + $0x248] sm:$0xff]  ;;  %v2751_v28 = vcombine.low %v132_v17, %v140_v18  ;;  %v150_v11 = vld [vmem:[#allocation2 + $0x318] sm:$0xff]  ;;  %v2785_v13 = vcombine.low %v165_v63, %v173_v1  ;;  %v2787_v14 = vcombine.low %v166_v2, %v174_v3  ;;  %v2770_v15 = vcombine.high %v149_v8, %v157_v9 }
  0x24   :  { %v2734_v29 = vcombine.high %v115_v23, %v123_v24  ;;  %v2736_v30 = vcombine.high %v116_v25, %v124_v26  ;;  %v99_v31 = vld [vmem:[#allocation2 + $0x180] sm:$0xff]  ;;  %v100_v33 = vld [vmem:[#allocation2 + $0x188] sm:$0xff]  ;;  %v2733_v35 = vcombine.low %v115_v23, %v123_v24  ;;  %v2735_v36 = vcombine.low %v116_v25, %v124_v26  ;;  %v158_v12 = vld [vmem:[#allocation2 + $0x358] sm:$0xff] }
  0x25   :  { %912 = vmatpush1.bf16.msra.mxu0 %v2765_v19  ;;  %955 = vmatpush1.bf16.msra.mxu1 %v2767_v20  ;;  %v107_v32 = vld [vmem:[#allocation2 + $0x1c0] sm:$0xff]  ;;  %v108_v34 = vld [vmem:[#allocation2 + $0x1c8] sm:$0xff]  ;;  %v2772_v16 = vcombine.high %v150_v11, %v158_v12  ;;  %v133_v17 = vld [vmem:[#allocation2 + $0x290] sm:$0xff] }
  0x26   :  { %913 = vmatprep.subr.bf16.mxu0 %v2750_v21  ;;  %956 = vmatprep.subr.bf16.mxu1 %v2752_v22  ;;  %v2718_v37 = vcombine.high %v99_v31, %v107_v32  ;;  %v2720_v38 = vcombine.high %v100_v33, %v108_v34  ;;  %v83_v39 = vld [vmem:[#allocation2 + $0x100] sm:$0xff]  ;;  %v84_v41 = vld [vmem:[#allocation2 + $0x108] sm:$0xff]  ;;  %v2717_v43 = vcombine.low %v99_v31, %v107_v32  ;;  %v141_v18 = vld [vmem:[#allocation2 + $0x2d0] sm:$0xff] }
  0x27   :  { %v91_v40 = vld [vmem:[#allocation2 + $0x140] sm:$0xff]  ;;  %v92_v42 = vld [vmem:[#allocation2 + $0x148] sm:$0xff]  ;;  %v2719_v44 = vcombine.low %v100_v33, %v108_v34  ;;  %v134_v19 = vld [vmem:[#allocation2 + $0x298] sm:$0xff]  ;;  %v2769_v21 = vcombine.low %v149_v8, %v157_v9  ;;  %v2771_v22 = vcombine.low %v150_v11, %v158_v12  ;;  %v2754_v23 = vcombine.high %v133_v17, %v141_v18 }
  0x28   :  { %v2702_v45 = vcombine.high %v83_v39, %v91_v40  ;;  %v2704_v46 = vcombine.high %v84_v41, %v92_v42  ;;  %v67_v47 = vld [vmem:[#allocation2 + $0x80] sm:$0xff]  ;;  %v68_v49 = vld [vmem:[#allocation2 + $0x88] sm:$0xff]  ;;  %v2701_v51 = vcombine.low %v83_v39, %v91_v40  ;;  %v2703_v52 = vcombine.low %v84_v41, %v92_v42  ;;  %v142_v20 = vld [vmem:[#allocation2 + $0x2d8] sm:$0xff] }
  0x29   :  { %914 = vmatpush1.bf16.msra.mxu0 %v2749_v27  ;;  %957 = vmatpush1.bf16.msra.mxu1 %v2751_v28  ;;  %v75_v48 = vld [vmem:[#allocation2 + $0xc0] sm:$0xff]  ;;  %v76_v50 = vld [vmem:[#allocation2 + $0xc8] sm:$0xff]  ;;  %v2756_v24 = vcombine.high %v134_v19, %v142_v20  ;;  %v117_v25 = vld [vmem:[#allocation2 + $0x210] sm:$0xff] }
  0x2a   :  { %915 = vmatprep.subr.bf16.mxu0 %v2734_v29  ;;  %958 = vmatprep.subr.bf16.mxu1 %v2736_v30  ;;  %v2686_v53 = vcombine.high %v67_v47, %v75_v48  ;;  %v2688_v54 = vcombine.high %v68_v49, %v76_v50  ;;  %v51_v55 = vld [vmem:[#allocation2] sm:$0xff]  ;;  %v52_v57 = vld [vmem:[#allocation2 + $0x8] sm:$0xff]  ;;  %v2685_v59 = vcombine.low %v67_v47, %v75_v48  ;;  %v125_v26 = vld [vmem:[#allocation2 + $0x250] sm:$0xff] }
  0x2b   :  { %v59_v56 = vld [vmem:[#allocation2 + $0x40] sm:$0xff]  ;;  %v60_v58 = vld [vmem:[#allocation2 + $0x48] sm:$0xff]  ;;  %v2687_v60 = vcombine.low %v68_v49, %v76_v50  ;;  %v118_v27 = vld [vmem:[#allocation2 + $0x218] sm:$0xff]  ;;  %v2753_v29 = vcombine.low %v133_v17, %v141_v18  ;;  %v2755_v30 = vcombine.low %v134_v19, %v142_v20  ;;  %v2738_v31 = vcombine.high %v117_v25, %v125_v26 }
  0x2c   :  { %v2670_v61 = vcombine.high %v51_v55, %v59_v56  ;;  %v2672_v62 = vcombine.high %v52_v57, %v60_v58  ;;  %v2669_v4 = vcombine.low %v51_v55, %v59_v56  ;;  %v2671_v5 = vcombine.low %v52_v57, %v60_v58  ;;  %v3329_v10 = vld [vmem:[%s3424_s0] sm:$0xff]   ;;  %v126_v28 = vld [vmem:[#allocation2 + $0x258] sm:$0xff]  ;;  %v101_v33 = vld [vmem:[#allocation2 + $0x190] sm:$0xff] }
  0x2d   :  { %916 = vmatpush1.bf16.msra.mxu0 %v2733_v35  ;;  %959 = vmatpush1.bf16.msra.mxu1 %v2735_v36  ;;  %v2740_v32 = vcombine.high %v118_v27, %v126_v28  ;;  %v109_v34 = vld [vmem:[#allocation2 + $0x1d0] sm:$0xff]  ;;  %v102_v35 = vld [vmem:[#allocation2 + $0x198] sm:$0xff]  ;;  %v2739_v39 = vcombine.low %v118_v27, %v126_v28  ;;  %v175_v2 = vld [vmem:[#allocation2 + $0x3e0] sm:$0xff] }
  0x2e   :  { %917 = vmatprep.subr.bf16.mxu0 %v2718_v37  ;;  %960 = vmatprep.subr.bf16.mxu1 %v2720_v38  ;;  %v110_v36 = vld [vmem:[#allocation2 + $0x1d8] sm:$0xff]  ;;  %v2737_v37 = vcombine.low %v117_v25, %v125_v26  ;;  %v85_v38 = vld [vmem:[#allocation2 + $0x110] sm:$0xff]  ;;  %v2722_v40 = vcombine.high %v101_v33, %v109_v34  ;;  %v151_v9 = vld [vmem:[#allocation2 + $0x320] sm:$0xff] }
  0x2f   :  { %v93_v41 = vld [vmem:[#allocation2 + $0x150] sm:$0xff]  ;;  %v2724_v42 = vcombine.high %v102_v35, %v110_v36  ;;  %v2723_v47 = vcombine.low %v102_v35, %v110_v36  ;;  %v159_v12 = vld [vmem:[#allocation2 + $0x360] sm:$0xff]  ;;  %v136_v20 = vld [vmem:[#allocation2 + $0x2a8] sm:$0xff] }
  0x30   :  { %v2706_v48 = vcombine.high %v85_v38, %v93_v41  ;;  %v77_v49 = vld [vmem:[#allocation2 + $0xd0] sm:$0xff]  ;;  %v143_v17 = vld [vmem:[#allocation2 + $0x2e0] sm:$0xff]  ;;  %v2774_v19 = vcombine.high %v151_v9, %v159_v12  ;;  %v120_v28 = vld [vmem:[#allocation2 + $0x228] sm:$0xff] }
  0x31   :  { %918 = vmatpush1.bf16.msra.mxu0 %v2717_v43  ;;  %961 = vmatpush1.bf16.msra.mxu1 %v2719_v44  ;;  %v86_v43 = vld [vmem:[#allocation2 + $0x118] sm:$0xff]  ;;  %v61_v57 = vld [vmem:[#allocation2 + $0x50] sm:$0xff]  ;;  %v127_v25 = vld [vmem:[#allocation2 + $0x260] sm:$0xff] }
  0x32   :  { %919 = vmatprep.subr.bf16.mxu0 %v2702_v45  ;;  %962 = vmatprep.subr.bf16.mxu1 %v2704_v46  ;;  %v94_v44 = vld [vmem:[#allocation2 + $0x158] sm:$0xff]  ;;  %v2721_v45 = vcombine.low %v101_v33, %v109_v34  ;;  %v69_v46 = vld [vmem:[#allocation2 + $0x90] sm:$0xff]  ;;  %v111_v33 = vld [vmem:[#allocation2 + $0x1e0] sm:$0xff] }
  0x33   :  { %v2708_v50 = vcombine.high %v86_v43, %v94_v44  ;;  %v2707_v55 = vcombine.low %v86_v43, %v94_v44  ;;  %v2690_v56 = vcombine.high %v69_v46, %v77_v49  ;;  %v104_v36 = vld [vmem:[#allocation2 + $0x1a8] sm:$0xff] }
  0x34   :  { %v88_v44 = vld [vmem:[#allocation2 + $0x128] sm:$0xff] }
  0x35   :  { %920 = vmatpush1.bf16.msra.mxu0 %v2701_v51  ;;  %963 = vmatpush1.bf16.msra.mxu1 %v2703_v52  ;;  %v70_v51 = vld [vmem:[#allocation2 + $0x98] sm:$0xff] }
  0x36   :  { %921 = vmatprep.subr.bf16.mxu0 %v2686_v53  ;;  %964 = vmatprep.subr.bf16.mxu1 %v2688_v54  ;;  %v78_v52 = vld [vmem:[#allocation2 + $0xd8] sm:$0xff]  ;;  %v2705_v53 = vcombine.low %v85_v38, %v93_v41  ;;  %v53_v54 = vld [vmem:[#allocation2 + $0x10] sm:$0xff]  ;;  %v95_v41 = vld [vmem:[#allocation2 + $0x160] sm:$0xff] }
  0x37   :  { %v2692_v58 = vcombine.high %v70_v51, %v78_v52  ;;  %v2691_v63 = vcombine.low %v70_v51, %v78_v52  ;;  %v2674_v1 = vcombine.high %v53_v54, %v61_v57  ;;  %v72_v52 = vld [vmem:[#allocation2 + $0xa8] sm:$0xff] }
  0x39   :  { %922 = vmatpush1.bf16.msra.mxu0 %v2685_v59  ;;  %965 = vmatpush1.bf16.msra.mxu1 %v2687_v60  ;;  %v54_v59 = vld [vmem:[#allocation2 + $0x18] sm:$0xff] }
  0x3a   :  { %923 = vmatprep.subr.bf16.mxu0 %v2670_v61  ;;  %966 = vmatprep.subr.bf16.mxu1 %v2672_v62  ;;  %v62_v60 = vld [vmem:[#allocation2 + $0x58] sm:$0xff]  ;;  %v2689_v61 = vcombine.low %v69_v46, %v77_v49  ;;  %v167_v62 = vld [vmem:[#allocation2 + $0x3a0] sm:$0xff] }
  0x3b   :  { %v2676_v3 = vcombine.high %v54_v59, %v62_v60  ;;  %v2790_v8 = vcombine.high %v167_v62, %v175_v2  ;;  %v79_v49 = vld [vmem:[#allocation2 + $0xe0] sm:$0xff] }
  0x3d   :  { %924 = vmatpush1.bf16.msra.mxu0 %v2669_v4  ;;  %967 = vmatpush1.bf16.msra.mxu1 %v2671_v5  ;;  %v168_v4 = vld [vmem:[#allocation2 + $0x3a8] sm:$0xff] }
  0x3e   :  { %995 = vmatprep.subr.bf16.mxu0 %v2786_v6  ;;  %1038 = vmatprep.subr.bf16.mxu1 %v2788_v7  ;;  %v176_v5 = vld [vmem:[#allocation2 + $0x3e8] sm:$0xff]  ;;  %v2673_v6 = vcombine.low %v53_v54, %v61_v57  ;;  %v2675_v7 = vcombine.low %v54_v59, %v62_v60  ;;  %v63_v57 = vld [vmem:[#allocation2 + $0x60] sm:$0xff] }
  0x3f   :  { %v2792_v11 = vcombine.high %v168_v4, %v176_v5  ;;  %v2791_v18 = vcombine.low %v168_v4, %v176_v5  ;;  %v56_v60 = vld [vmem:[#allocation2 + $0x28] sm:$0xff]  ;;  %v170_v5 = vld [vmem:[#allocation2 + $0x3b8] sm:$0xff] }
  0x40   :  { %942 = vmatmul.mubr.bf16.vlgmr.msra.gmra.mxu0 %v3329_v10  ;;  %985 = vmatmul.mubr.bf16.vlgmr.msra.gmra.mxu1 %v3329_v10 }
  0x41   :  { %996 = vmatpush1.bf16.msra.mxu0 %v2785_v13  ;;  %1039 = vmatpush1.bf16.msra.mxu1 %v2787_v14  ;;  %v152_v13 = vld [vmem:[#allocation2 + $0x328] sm:$0xff] }
  0x42   :  { %997 = vmatprep.subr.bf16.mxu0 %v2770_v15  ;;  %1040 = vmatprep.subr.bf16.mxu1 %v2772_v16  ;;  %v160_v14 = vld [vmem:[#allocation2 + $0x368] sm:$0xff]  ;;  %v2789_v15 = vcombine.low %v167_v62, %v175_v2  ;;  %v135_v16 = vld [vmem:[#allocation2 + $0x2a0] sm:$0xff]  ;;  %v177_v2 = vld [vmem:[#allocation2 + $0x3f0] sm:$0xff] }
  0x43   :  { %1027 = vmatprep.mubr.bf16.mxu0 %v3287_v0  ;;  %1070 = vmatprep.mubr.bf16.mxu1 %v3287_v0  ;;  %v2775_v26 = vcombine.low %v152_v13, %v160_v14  ;;  %v2758_v27 = vcombine.high %v135_v16, %v143_v17 }
  0x45   :  { %998 = vmatpush1.bf16.msra.mxu0 %v2769_v21  ;;  %1041 = vmatpush1.bf16.msra.mxu1 %v2771_v22  ;;  %v144_v21 = vld [vmem:[#allocation2 + $0x2e8] sm:$0xff]  ;;  %v2776_v22 = vcombine.high %v152_v13, %v160_v14  ;;  %v154_v14 = vld [vmem:[#allocation2 + $0x338] sm:$0xff] }
  0x46   :  { %999 = vmatprep.subr.bf16.mxu0 %v2754_v23  ;;  %1042 = vmatprep.subr.bf16.mxu1 %v2756_v24  ;;  %v2773_v23 = vcombine.low %v151_v9, %v159_v12  ;;  %v119_v24 = vld [vmem:[#allocation2 + $0x220] sm:$0xff]  ;;  %v2759_v34 = vcombine.low %v136_v20, %v144_v21  ;;  %v153_v9 = vld [vmem:[#allocation2 + $0x330] sm:$0xff] }
  0x47   :  { %v2742_v35 = vcombine.high %v119_v24, %v127_v25 }
  0x49   :  { %1000 = vmatpush1.bf16.msra.mxu0 %v2753_v29  ;;  %1043 = vmatpush1.bf16.msra.mxu1 %v2755_v30  ;;  %v128_v29 = vld [vmem:[#allocation2 + $0x268] sm:$0xff]  ;;  %v2760_v30 = vcombine.high %v136_v20, %v144_v21 }
  0x4a   :  { %1001 = vmatprep.subr.bf16.mxu0 %v2738_v31  ;;  %1044 = vmatprep.subr.bf16.mxu1 %v2740_v32  ;;  %v2757_v31 = vcombine.low %v135_v16, %v143_v17  ;;  %v103_v32 = vld [vmem:[#allocation2 + $0x1a0] sm:$0xff]  ;;  %v2744_v38 = vcombine.high %v120_v28, %v128_v29 }
  0x4b   :  { %v2726_v43 = vcombine.high %v103_v32, %v111_v33 }
  0x4d   :  { %1002 = vmatpush1.bf16.msra.mxu0 %v2737_v37  ;;  %1045 = vmatpush1.bf16.msra.mxu1 %v2739_v39  ;;  %v112_v37 = vld [vmem:[#allocation2 + $0x1e8] sm:$0xff]  ;;  %v2741_v39 = vcombine.low %v119_v24, %v127_v25  ;;  %v146_v24 = vld [vmem:[#allocation2 + $0x2f8] sm:$0xff] }
  0x4e   :  { %1003 = vmatprep.subr.bf16.mxu0 %v2722_v40  ;;  %1046 = vmatprep.subr.bf16.mxu1 %v2724_v42  ;;  %v87_v40 = vld [vmem:[#allocation2 + $0x120] sm:$0xff]  ;;  %v2743_v42 = vcombine.low %v120_v28, %v128_v29  ;;  %v2728_v46 = vcombine.high %v104_v36, %v112_v37 }
  0x4f   :  { %v2710_v51 = vcombine.high %v87_v40, %v95_v41 }
  0x51   :  { %1004 = vmatpush1.bf16.msra.mxu0 %v2721_v45  ;;  %1047 = vmatpush1.bf16.msra.mxu1 %v2723_v47  ;;  %v96_v45 = vld [vmem:[#allocation2 + $0x168] sm:$0xff]  ;;  %v2725_v47 = vcombine.low %v103_v32, %v111_v33 }
  0x52   :  { %1005 = vmatprep.subr.bf16.mxu0 %v2706_v48  ;;  %1048 = vmatprep.subr.bf16.mxu1 %v2708_v50  ;;  %v71_v48 = vld [vmem:[#allocation2 + $0xa0] sm:$0xff]  ;;  %v2727_v50 = vcombine.low %v104_v36, %v112_v37  ;;  %v2712_v54 = vcombine.high %v88_v44, %v96_v45 }
  0x53   :  { %v2694_v59 = vcombine.high %v71_v48, %v79_v49 }
  0x55   :  { %1006 = vmatpush1.bf16.msra.mxu0 %v2705_v53  ;;  %1049 = vmatpush1.bf16.msra.mxu1 %v2707_v55  ;;  %v80_v53 = vld [vmem:[#allocation2 + $0xe8] sm:$0xff]  ;;  %v2709_v55 = vcombine.low %v87_v40, %v95_v41 }
  0x56   :  { %1007 = vmatprep.subr.bf16.mxu0 %v2690_v56  ;;  %1050 = vmatprep.subr.bf16.mxu1 %v2692_v58  ;;  %v55_v56 = vld [vmem:[#allocation2 + $0x20] sm:$0xff]  ;;  %v2711_v58 = vcombine.low %v88_v44, %v96_v45  ;;  %v2696_v62 = vcombine.high %v72_v52, %v80_v53  ;;  %v90_v45 = vld [vmem:[#allocation2 + $0x138] sm:$0xff] }
  0x57   :  { %v2678_v4 = vcombine.high %v55_v56, %v63_v57 }
  0x59   :  { %1008 = vmatpush1.bf16.msra.mxu0 %v2689_v61  ;;  %1051 = vmatpush1.bf16.msra.mxu1 %v2691_v63  ;;  %v64_v61 = vld [vmem:[#allocation2 + $0x68] sm:$0xff]  ;;  %v2693_v63 = vcombine.low %v71_v48, %v79_v49 }
  0x5a   :  { %1009 = vmatprep.subr.bf16.mxu0 %v2674_v1  ;;  %1052 = vmatprep.subr.bf16.mxu1 %v2676_v3  ;;  %v169_v1 = vld [vmem:[#allocation2 + $0x3b0] sm:$0xff]  ;;  %v2695_v3 = vcombine.low %v72_v52, %v80_v53  ;;  %v2679_v12 = vcombine.low %v56_v60, %v64_v61 }
  0x5b   :  { %v2794_v13 = vcombine.high %v169_v1, %v177_v2  ;;  %v2793_v17 = vcombine.low %v169_v1, %v177_v2  ;;  %v81_v52 = vld [vmem:[#allocation2 + $0xf0] sm:$0xff] }
  0x5d   :  { %1010 = vmatpush1.bf16.msra.mxu0 %v2673_v6  ;;  %1053 = vmatpush1.bf16.msra.mxu1 %v2675_v7  ;;  %v178_v6 = vld [vmem:[#allocation2 + $0x3f8] sm:$0xff]  ;;  %v2680_v7 = vcombine.high %v56_v60, %v64_v61  ;;  %v65_v60 = vld [vmem:[#allocation2 + $0x70] sm:$0xff] }
  0x5e   :  { %1081 = vmatprep.subr.bf16.mxu0 %v2790_v8  ;;  %1124 = vmatprep.subr.bf16.mxu1 %v2792_v11  ;;  %v2677_v8 = vcombine.low %v55_v56, %v63_v57  ;;  %v161_v11 = vld [vmem:[#allocation2 + $0x370] sm:$0xff]  ;;  %v2796_v16 = vcombine.high %v170_v5, %v178_v6  ;;  %v2795_v20 = vcombine.low %v170_v5, %v178_v6  ;;  %v3109_v6 = vld [vmem:[#allocation4 + $0x78] sm:$0xff]  }
  0x5f   :  { %v2778_v21 = vcombine.high %v153_v9, %v161_v11  ;;  %v2777_v25 = vcombine.low %v153_v9, %v161_v11  ;;  %v57_v57 = vld [vmem:[#allocation2 + $0x30] sm:$0xff]  ;;  %v3111_v9 = vld [vmem:[#allocation4 + $0x38] sm:$0xff]  }
  0x60   :  { %1028 = vmatmul.mubr.bf16.vlgmr.msra.gmra.mxu0 %v3329_v10  ;;  %1071 = vmatmul.mubr.bf16.vlgmr.msra.gmra.mxu1 %v3329_v10  ;;  %v2681_v5 = vcombine.low %v57_v57, %v65_v60  ;;  %v3112_v11 = vld [vmem:[#allocation4 + $0xb8] sm:$0xff]  }
  0x61   :  { %1082 = vmatpush1.bf16.msra.mxu0 %v2789_v15  ;;  %1125 = vmatpush1.bf16.msra.mxu1 %v2791_v18  ;;  %v162_v15 = vld [vmem:[#allocation2 + $0x378] sm:$0xff]  ;;  %v137_v18 = vld [vmem:[#allocation2 + $0x2b0] sm:$0xff] }
  0x62   :  { %1083 = vmatprep.subr.bf16.mxu0 %v2774_v19  ;;  %1126 = vmatprep.subr.bf16.mxu1 %v2776_v22  ;;  %v145_v19 = vld [vmem:[#allocation2 + $0x2f0] sm:$0xff]  ;;  %v138_v22 = vld [vmem:[#allocation2 + $0x2b8] sm:$0xff]  ;;  %v2779_v28 = vcombine.low %v154_v14, %v162_v15 }
  0x63   :  { %1113 = vmatprep.mubr.bf16.mxu0 %v3287_v0  ;;  %1156 = vmatprep.mubr.bf16.mxu1 %v3287_v0  ;;  %v2762_v29 = vcombine.high %v137_v18, %v145_v19  ;;  %v2764_v32 = vcombine.high %v138_v22, %v146_v24  ;;  %v2761_v33 = vcombine.low %v137_v18, %v145_v19  ;;  %v3118_v18 = vld [vmem:[#allocation4 + $0xe8] sm:$0xff]  }
  0x64   :  { %v2763_v36 = vcombine.low %v138_v22, %v146_v24  ;;  %v3119_v19 = vld [vmem:[#allocation4 + $0x28] sm:$0xff]   ;;  %v3123_v22 = vld [vmem:[#allocation4 + $0x20] sm:$0xff]   ;;  %v3125_v24 = vld [vmem:[#allocation4 + $0x58] sm:$0xff]  }
  0x65   :  { %1084 = vmatpush1.bf16.msra.mxu0 %v2773_v23  ;;  %1127 = vmatpush1.bf16.msra.mxu1 %v2775_v26  ;;  %v2780_v23 = vcombine.high %v154_v14, %v162_v15  ;;  %v121_v26 = vld [vmem:[#allocation2 + $0x230] sm:$0xff]  ;;  %v3237_v14 = vld [vmem:[%s3424_s0] sm:$0xff]  }
  0x66   :  { %1085 = vmatprep.subr.bf16.mxu0 %v2758_v27  ;;  %1128 = vmatprep.subr.bf16.mxu1 %v2760_v30  ;;  %v129_v27 = vld [vmem:[#allocation2 + $0x270] sm:$0xff]  ;;  %v122_v30 = vld [vmem:[#allocation2 + $0x238] sm:$0xff] }
  0x67   :  { %v2746_v37 = vcombine.high %v121_v26, %v129_v27  ;;  %v2745_v41 = vcombine.low %v121_v26, %v129_v27  ;;  %v3115_v15 = vld [vmem:[#allocation4 + $0x30] sm:$0xff]   ;;  %v3127_v26 = vld [vmem:[#allocation4 + $0x18] sm:$0xff]  }
  0x68   :  { %v3128_v27 = vld [vmem:[#allocation4 + $0x98] sm:$0xff]  }
  0x69   :  { %1086 = vmatpush1.bf16.msra.mxu0 %v2757_v31  ;;  %1129 = vmatpush1.bf16.msra.mxu1 %v2759_v34  ;;  %v130_v31 = vld [vmem:[#allocation2 + $0x278] sm:$0xff]  ;;  %v105_v34 = vld [vmem:[#allocation2 + $0x1b0] sm:$0xff] }
  0x6a   :  { %1087 = vmatprep.subr.bf16.mxu0 %v2742_v35  ;;  %1130 = vmatprep.subr.bf16.mxu1 %v2744_v38  ;;  %v113_v35 = vld [vmem:[#allocation2 + $0x1f0] sm:$0xff]  ;;  %v106_v38 = vld [vmem:[#allocation2 + $0x1b8] sm:$0xff]  ;;  %v2748_v40 = vcombine.high %v122_v30, %v130_v31  ;;  %v2747_v44 = vcombine.low %v122_v30, %v130_v31 }
  0x6b   :  { %v2729_v48 = vcombine.low %v105_v34, %v113_v35  ;;  %v3131_v30 = vld [vmem:[#allocation4 + $0x10] sm:$0xff]  }
  0x6c   :  { %v3132_v31 = vld [vmem:[#allocation4 + $0x90] sm:$0xff]  }
  0x6d   :  { %1088 = vmatpush1.bf16.msra.mxu0 %v2741_v39  ;;  %1131 = vmatpush1.bf16.msra.mxu1 %v2743_v42  ;;  %v114_v39 = vld [vmem:[#allocation2 + $0x1f8] sm:$0xff]  ;;  %v89_v42 = vld [vmem:[#allocation2 + $0x130] sm:$0xff] }
  0x6e   :  { %1089 = vmatprep.subr.bf16.mxu0 %v2726_v43  ;;  %1132 = vmatprep.subr.bf16.mxu1 %v2728_v46  ;;  %v97_v43 = vld [vmem:[#allocation2 + $0x170] sm:$0xff]  ;;  %v98_v46 = vld [vmem:[#allocation2 + $0x178] sm:$0xff]  ;;  %v2731_v49 = vcombine.low %v106_v38, %v114_v39 }
  0x6f   :  { %v2716_v53 = vcombine.high %v90_v45, %v98_v46  ;;  %v2713_v56 = vcombine.low %v89_v42, %v97_v43 }
  0x71   :  { %1090 = vmatpush1.bf16.msra.mxu0 %v2725_v47  ;;  %1133 = vmatpush1.bf16.msra.mxu1 %v2727_v50  ;;  %v2732_v47 = vcombine.high %v106_v38, %v114_v39  ;;  %v2714_v50 = vcombine.high %v89_v42, %v97_v43  ;;  %v3139_v38 = vld [vmem:[#allocation4] sm:$0xff]   ;;  %v183_v42 = vlaneseq }
  0x72   :  { %1091 = vmatprep.subr.bf16.mxu0 %v2710_v51  ;;  %1134 = vmatprep.subr.bf16.mxu1 %v2712_v54  ;;  %v73_v51 = vld [vmem:[#allocation2 + $0xb0] sm:$0xff]  ;;  %v74_v54 = vld [vmem:[#allocation2 + $0xb8] sm:$0xff]  ;;  %v3140_v39 = vld [vmem:[#allocation4 + $0x80] sm:$0xff]  }
  0x73   :  { %v2697_v1 = vcombine.low %v73_v51, %v81_v52  ;;  %v3347_v43 = vshrl.u32 %v183_v42, 7 }
  0x75   :  { %1092 = vmatpush1.bf16.msra.mxu0 %v2709_v55  ;;  %1135 = vmatpush1.bf16.msra.mxu1 %v2711_v58  ;;  %v82_v55 = vld [vmem:[#allocation2 + $0xf8] sm:$0xff]  ;;  %v2715_v58 = vcombine.low %v90_v45, %v98_v46  ;;  %v3354_v45 = vld [vmem:[%s3426_s2] sm:$0xff]  ;;  %v185_v46 = vsub.s32 0, %v3347_v43 }
  0x76   :  { %1093 = vmatprep.subr.bf16.mxu0 %v2694_v59  ;;  %1136 = vmatprep.subr.bf16.mxu1 %v2696_v62  ;;  %v2698_v59 = vcombine.high %v73_v51, %v81_v52  ;;  %v2700_v61 = vcombine.high %v74_v54, %v82_v55  ;;  %v58_v62 = vld [vmem:[#allocation2 + $0x38] sm:$0xff]  ;;  %v2699_v2 = vcombine.low %v74_v54, %v82_v55 }
  0x77   :  { %v186_v52 = vrot.slane %v3354_v45, %v185_v46 }
  0x79   :  { %1094 = vmatpush1.bf16.msra.mxu0 %v2693_v63  ;;  %1137 = vmatpush1.bf16.msra.mxu1 %v2695_v3  ;;  %v66_v63 = vld [vmem:[#allocation2 + $0x78] sm:$0xff]  ;;  %v2682_v3 = vcombine.high %v57_v57, %v65_v60 }
  0x7a   :  { %1095 = vmatprep.subr.bf16.mxu0 %v2678_v4  ;;  %1138 = vmatprep.subr.bf16.mxu1 %v2680_v7  ;;  %v2684_v4 = vcombine.high %v58_v62, %v66_v63  ;;  %v2683_v7 = vcombine.low %v58_v62, %v66_v63 }
  0x7d   :  { %1096 = vmatpush1.bf16.msra.mxu0 %v2677_v8  ;;  %1139 = vmatpush1.bf16.msra.mxu1 %v2679_v12  ;;  %v3110_v8 = vld [vmem:[#allocation4 + $0xf8] sm:$0xff]   ;;  %v3113_v12 = vld [vmem:[#allocation4 + $0x70] sm:$0xff]  }
  0x7e   :  { %1167 = vmatprep.subr.bf16.mxu0 %v2794_v13  ;;  %1210 = vmatprep.subr.bf16.mxu1 %v2796_v16  ;;  %v3114_v13 = vld [vmem:[#allocation4 + $0xf0] sm:$0xff]  }
  0x7f   :  { %v3116_v16 = vld [vmem:[#allocation4 + $0xb0] sm:$0xff]  }
  0x80   :  { %1114 = vmatmul.mubr.bf16.vlgmr.msra.gmra.mxu0 %v3329_v10  ;;  %1157 = vmatmul.mubr.bf16.vlgmr.msra.gmra.mxu1 %v3329_v10 }
  0x81   :  { %1168 = vmatpush1.bf16.msra.mxu0 %v2793_v17  ;;  %1211 = vmatpush1.bf16.msra.mxu1 %v2795_v20  ;;  %v3117_v17 = vld [vmem:[#allocation4 + $0x68] sm:$0xff]  }
  0x82   :  { %1169 = vmatprep.subr.bf16.mxu0 %v2778_v21  ;;  %1212 = vmatprep.subr.bf16.mxu1 %v2780_v23  ;;  %v3120_v20 = vld [vmem:[#allocation4 + $0xa8] sm:$0xff]   ;;  %v3121_v21 = vld [vmem:[#allocation4 + $0x60] sm:$0xff]  }
  0x83   :  { %1199 = vmatprep.mubr.bf16.mxu0 %v3287_v0  ;;  %1242 = vmatprep.mubr.bf16.mxu1 %v3287_v0  ;;  %v2730_v0 = vcombine.high %v105_v34, %v113_v35  ;;  %v3124_v23 = vld [vmem:[#allocation4 + $0xa0] sm:$0xff]   ;;  %v3135_v34 = vld [vmem:[#allocation4 + $0x8] sm:$0xff]  }
  0x84   :  { %v3136_v35 = vld [vmem:[#allocation4 + $0x88] sm:$0xff]  }
  0x85   :  { %1170 = vmatpush1.bf16.msra.mxu0 %v2777_v25  ;;  %1213 = vmatpush1.bf16.msra.mxu1 %v2779_v28  ;;  %v3126_v25 = vld [vmem:[#allocation4 + $0xd8] sm:$0xff]   ;;  %v3129_v28 = vld [vmem:[#allocation4 + $0x50] sm:$0xff]  }
  0x86   :  { %1171 = vmatprep.subr.bf16.mxu0 %v2762_v29  ;;  %1214 = vmatprep.subr.bf16.mxu1 %v2764_v32  ;;  %v3130_v29 = vld [vmem:[#allocation4 + $0xd0] sm:$0xff]   ;;  %v3133_v32 = vld [vmem:[#allocation4 + $0x48] sm:$0xff]  }
  0x89   :  { %1172 = vmatpush1.bf16.msra.mxu0 %v2761_v33  ;;  %1215 = vmatpush1.bf16.msra.mxu1 %v2763_v36  ;;  %v3134_v33 = vld [vmem:[#allocation4 + $0xc8] sm:$0xff]   ;;  %v3137_v36 = vld [vmem:[#allocation4 + $0x40] sm:$0xff]  }
  0x8a   :  { %1173 = vmatprep.subr.bf16.mxu0 %v2746_v37  ;;  %1216 = vmatprep.subr.bf16.mxu1 %v2748_v40  ;;  %v3138_v37 = vld [vmem:[#allocation4 + $0xc0] sm:$0xff]   ;;  %v3141_v40 = vld [vmem:[#allocation4 + $0x178] sm:$0xff]  }
  0x8d   :  { %1174 = vmatpush1.bf16.msra.mxu0 %v2745_v41  ;;  %1217 = vmatpush1.bf16.msra.mxu1 %v2747_v44  ;;  %v3142_v41 = vld [vmem:[#allocation4 + $0x1f8] sm:$0xff]   ;;  %v193_v44 = vsub.s32 2, %v3347_v43 }
  0x8e   :  { %1175 = vmatprep.subr.bf16.mxu0 %v2730_v0  ;;  %1218 = vmatprep.subr.bf16.mxu1 %v2732_v47  ;;  %v189_v0 = vsub.s32 1, %v3347_v43  ;;  %v197_v47 = vsub.s32 3, %v3347_v43 }
  0x90   :  { %v190_v51 = vrot.slane %v3354_v45, %v189_v0  ;;  %v198_v54 = vrot.slane %v3354_v45, %v197_v47 }
  0x91   :  { %1176 = vmatpush1.bf16.msra.mxu0 %v2729_v48  ;;  %1219 = vmatpush1.bf16.msra.mxu1 %v2731_v49  ;;  %v194_v49 = vrot.slane %v3354_v45, %v193_v44 }
  0x92   :  { %1177 = vmatprep.subr.bf16.mxu0 %v2714_v50  ;;  %1220 = vmatprep.subr.bf16.mxu1 %v2716_v53 }
  0x95   :  { %1178 = vmatpush1.bf16.msra.mxu0 %v2713_v56  ;;  %1221 = vmatpush1.bf16.msra.mxu1 %v2715_v58 }
  0x96   :  { %1179 = vmatprep.subr.bf16.mxu0 %v2698_v59  ;;  %1222 = vmatprep.subr.bf16.mxu1 %v2700_v61 }
  0x99   :  { %1180 = vmatpush1.bf16.msra.mxu0 %v2697_v1  ;;  %1223 = vmatpush1.bf16.msra.mxu1 %v2699_v2 }
  0x9a   :  { %1181 = vmatprep.subr.bf16.mxu0 %v2682_v3  ;;  %1224 = vmatprep.subr.bf16.mxu1 %v2684_v4 }
  0x9d   :  { %1182 = vmatpush1.bf16.msra.mxu0 %v2681_v5  ;;  %1225 = vmatpush1.bf16.msra.mxu1 %v2683_v7 }
  0x9e   :  { %2926 = vmatprep.subr.bf16.mxu0 %v3109_v6  ;;  %2948 = vmatprep.subr.bf16.mxu1 %v3110_v8 }
  0xa0   :  { %1200 = vmatmul.mubr.bf16.vlgmr.msra.gmra.mxu0 %v3329_v10  ;;  %1243 = vmatmul.mubr.bf16.vlgmr.msra.gmra.mxu1 %v3237_v14  ;;  %v3122_v10 = vld [vmem:[#allocation4 + $0xe0] sm:$0xff]  }
  0xa1   :  { %2927 = vmatpush3.bf16.msra.mxu0 %v3111_v9  ;;  %2949 = vmatpush3.bf16.msra.mxu1 %v3112_v11 }
  0xa2   :  { %2928 = vmatprep.subr.bf16.mxu0 %v3113_v12  ;;  %2950 = vmatprep.subr.bf16.mxu1 %v3114_v13 }
  0xa5   :  { %2929 = vmatpush3.bf16.msra.mxu0 %v3115_v15  ;;  %2951 = vmatpush3.bf16.msra.mxu1 %v3116_v16  ;;  %v3143_v15 = vld [vmem:[#allocation4 + $0x138] sm:$0xff]  }
  0xa6   :  { %2930 = vmatprep.subr.bf16.mxu0 %v3117_v17  ;;  %2952 = vmatprep.subr.bf16.mxu1 %v3118_v18  ;;  %v3144_v18 = vld [vmem:[#allocation4 + $0x1b8] sm:$0xff]  }
  0xa9   :  { %2931 = vmatpush3.bf16.msra.mxu0 %v3119_v19  ;;  %2953 = vmatpush3.bf16.msra.mxu1 %v3120_v20  ;;  %v3145_v19 = vld [vmem:[#allocation4 + $0x170] sm:$0xff]  }
  0xaa   :  { %2932 = vmatprep.subr.bf16.mxu0 %v3121_v21  ;;  %2954 = vmatprep.subr.bf16.mxu1 %v3122_v10  ;;  %v3146_v21 = vld [vmem:[#allocation4 + $0x1f0] sm:$0xff]  }
  0xab   :  { %v3147_v10 = vld [vmem:[#allocation4 + $0x130] sm:$0xff]  }
  0xad   :  { %2933 = vmatpush3.bf16.msra.mxu0 %v3123_v22  ;;  %2955 = vmatpush3.bf16.msra.mxu1 %v3124_v23  ;;  %v3148_v22 = vld [vmem:[#allocation4 + $0x1b0] sm:$0xff]   ;;  %v3149_v23 = vld [vmem:[#allocation4 + $0x168] sm:$0xff]  }
  0xae   :  { %2934 = vmatprep.subr.bf16.mxu0 %v3125_v24  ;;  %2956 = vmatprep.subr.bf16.mxu1 %v3126_v25  ;;  %v3150_v24 = vld [vmem:[#allocation4 + $0x1e8] sm:$0xff]  }
  0xaf   :  { %v3151_v25 = vld [vmem:[#allocation4 + $0x128] sm:$0xff]  }
  0xb1   :  { %2935 = vmatpush3.bf16.msra.mxu0 %v3127_v26  ;;  %2957 = vmatpush3.bf16.msra.mxu1 %v3128_v27  ;;  %v3152_v26 = vld [vmem:[#allocation4 + $0x1a8] sm:$0xff]   ;;  %v3153_v27 = vld [vmem:[#allocation4 + $0x160] sm:$0xff]  }
  0xb2   :  { %2936 = vmatprep.subr.bf16.mxu0 %v3129_v28  ;;  %2958 = vmatprep.subr.bf16.mxu1 %v3130_v29  ;;  %v3154_v28 = vld [vmem:[#allocation4 + $0x1e0] sm:$0xff]  }
  0xb3   :  { %v3155_v29 = vld [vmem:[#allocation4 + $0x120] sm:$0xff]  }
  0xb5   :  { %2937 = vmatpush3.bf16.msra.mxu0 %v3131_v30  ;;  %2959 = vmatpush3.bf16.msra.mxu1 %v3132_v31  ;;  %v3156_v30 = vld [vmem:[#allocation4 + $0x1a0] sm:$0xff]   ;;  %v3157_v31 = vld [vmem:[#allocation4 + $0x158] sm:$0xff]  }
  0xb6   :  { %2938 = vmatprep.subr.bf16.mxu0 %v3133_v32  ;;  %2960 = vmatprep.subr.bf16.mxu1 %v3134_v33  ;;  %v3158_v32 = vld [vmem:[#allocation4 + $0x1d8] sm:$0xff]  }
  0xb7   :  { %v3159_v33 = vld [vmem:[#allocation4 + $0x118] sm:$0xff]  }
  0xb9   :  { %2939 = vmatpush3.bf16.msra.mxu0 %v3135_v34  ;;  %2961 = vmatpush3.bf16.msra.mxu1 %v3136_v35  ;;  %v3160_v34 = vld [vmem:[#allocation4 + $0x198] sm:$0xff]   ;;  %v3161_v35 = vld [vmem:[#allocation4 + $0x150] sm:$0xff]  }
  0xba   :  { %2940 = vmatprep.subr.bf16.mxu0 %v3137_v36  ;;  %2962 = vmatprep.subr.bf16.mxu1 %v3138_v37  ;;  %v209_v36 = vsub.s32 6, %v3347_v43  ;;  %v205_v37 = vsub.s32 5, %v3347_v43 }
  0xbd   :  { %2941 = vmatpush3.bf16.msra.mxu0 %v3139_v38  ;;  %2963 = vmatpush3.bf16.msra.mxu1 %v3140_v39  ;;  %v3162_v38 = vld [vmem:[#allocation4 + $0x1d0] sm:$0xff]   ;;  %v201_v39 = vsub.s32 4, %v3347_v43 }
  0xbe   :  { %2970 = vmatprep.subr.bf16.mxu0 %v3141_v40  ;;  %2992 = vmatprep.subr.bf16.mxu1 %v3142_v41  ;;  %v213_v40 = vsub.s32 7, %v3347_v43  ;;  %v3163_v41 = vld [vmem:[#allocation4 + $0x110] sm:$0xff]  }
 0x100   :  { %v943_v48 = vpop.f32.mrf.mxu0  ;;  %v986_v50 = vpop.f32.mrf.mxu1 }
 0x101   :  { %v987_v57 = vadd.f32 %v986_v50, %v194_v49  ;;  %v944_v61 = vadd.f32 %v943_v48, %v186_v52  ;;  %v3164_v48 = vld [vmem:[#allocation4 + $0x190] sm:$0xff]   ;;  %v210_v50 = vrot.slane %v3354_v45, %v209_v36 }
 0x102   :  { %v945_v53 = vpop.f32.mrf.mxu0  ;;  %v988_v55 = vpop.f32.mrf.mxu1 }
 0x103   :  { %v946_v58 = vadd.f32 %v945_v53, %v190_v51  ;;  %v989_v62 = vadd.f32 %v988_v55, %v198_v54  ;;  %v1255_v6 = vmax.f32 %v987_v57, 0.0  ;;  %v1253_v11 = vmax.f32 %v944_v61, 0.0  ;;  %v3166_v53 = vld [vmem:[#allocation4 + $0x1c8] sm:$0xff]   ;;  %v3169_v61 = vld [vmem:[#allocation4 + $0x140] sm:$0xff]  }
 0x104   :  { %v947_v56 = vpop.f32.mrf.mxu0  ;;  %v990_v60 = vpop.f32.mrf.mxu1 }
 0x105   :  { %v948_v59 = vadd.f32 %v947_v56, %v186_v52  ;;  %v991_v63 = vadd.f32 %v990_v60, %v194_v49  ;;  %v1254_v7 = vmax.f32 %v946_v58, 0.0  ;;  %v1256_v12 = vmax.f32 %v989_v62, 0.0  ;;  %v3165_v49 = vld [vmem:[#allocation4 + $0x148] sm:$0xff]  }
 0x106   :  { %v949_v1 = vpop.f32.mrf.mxu0  ;;  %v992_v3 = vpop.f32.mrf.mxu1  ;;  %v206_v52 = vrot.slane %v3354_v45, %v205_v37  ;;  %v214_v56 = vrot.slane %v3354_v45, %v213_v40  ;;  %v3167_v58 = vld [vmem:[#allocation4 + $0x108] sm:$0xff]  }
 0x107   :  { %v950_v2 = vadd.f32 %v949_v1, %v190_v51  ;;  %v1269_v4 = vmax.f32 %v948_v59, 0.0  ;;  %v993_v5 = vadd.f32 %v992_v3, %v198_v54  ;;  %v1271_v8 = vmax.f32 %v991_v63, 0.0  ;;  %v3168_v60 = vld [vmem:[#allocation4 + $0x188] sm:$0xff]   ;;  %v3170_v3 = vld [vmem:[#allocation4 + $0x1c0] sm:$0xff]  }
 0x108   :  { %v202_v54 = vrot.slane %v3354_v45, %v201_v39 }
 0x109   :  { %v1270_v9 = vmax.f32 %v950_v2, 0.0  ;;  %v1272_v13 = vmax.f32 %v993_v5, 0.0  ;;  %v1285_v16 = vpack.c.bf16 %v1269_v4, %v1253_v11  ;;  %v1287_v20 = vpack.c.bf16 %v1271_v8, %v1255_v6 }
 0x10b   :  { %v1286_v14 = vpack.c.bf16 %v1270_v9, %v1254_v7  ;;  %v1288_v17 = vpack.c.bf16 %v1272_v13, %v1256_v12  ;;  %v3171_v9 = vld [vmem:[#allocation4 + $0x100] sm:$0xff]  }
 0x10c   :  { %v3172_v13 = vld [vmem:[#allocation4 + $0x180] sm:$0xff]  }
 0x10d   :  { %2364 = vmatprep.mubr.bf16.mxu0 %v1286_v14  ;;  %2405 = vmatprep.mubr.bf16.mxu1 %v1288_v17  ;;  %v3173_v14 = vld [vmem:[#allocation4 + $0x278] sm:$0xff]  }
 0x10e   :  { %2365 = vmatmul.mubr.bf16.vlgmr.msra.gmra.mxu0 %v1285_v16  ;;  %2406 = vmatmul.mubr.bf16.vlgmr.msra.gmra.mxu1 %v1287_v20 }
 0x10f   :  { %2971 = vmatpush3.bf16.msra.mxu0 %v3143_v15  ;;  %2993 = vmatpush3.bf16.msra.mxu1 %v3144_v18 }
 0x110   :  { %2972 = vmatprep.subr.bf16.mxu0 %v3145_v19  ;;  %2994 = vmatprep.subr.bf16.mxu1 %v3146_v21  ;;  %v3174_v19 = vld [vmem:[#allocation4 + $0x2f8] sm:$0xff]  }
 0x113   :  { %2973 = vmatpush3.bf16.msra.mxu0 %v3147_v10  ;;  %2995 = vmatpush3.bf16.msra.mxu1 %v3148_v22 }
 0x114   :  { %2974 = vmatprep.subr.bf16.mxu0 %v3149_v23  ;;  %2996 = vmatprep.subr.bf16.mxu1 %v3150_v24  ;;  %v3175_v23 = vld [vmem:[#allocation4 + $0x238] sm:$0xff]  }
 0x117   :  { %2975 = vmatpush3.bf16.msra.mxu0 %v3151_v25  ;;  %2997 = vmatpush3.bf16.msra.mxu1 %v3152_v26  ;;  %v3176_v26 = vld [vmem:[#allocation4 + $0x2b8] sm:$0xff]  }
 0x118   :  { %2976 = vmatprep.subr.bf16.mxu0 %v3153_v27  ;;  %2998 = vmatprep.subr.bf16.mxu1 %v3154_v28  ;;  %v3177_v27 = vld [vmem:[#allocation4 + $0x270] sm:$0xff]  }
 0x11b   :  { %2977 = vmatpush3.bf16.msra.mxu0 %v3155_v29  ;;  %2999 = vmatpush3.bf16.msra.mxu1 %v3156_v30  ;;  %v3178_v29 = vld [vmem:[#allocation4 + $0x2f0] sm:$0xff]  }
 0x11c   :  { %2978 = vmatprep.subr.bf16.mxu0 %v3157_v31  ;;  %3000 = vmatprep.subr.bf16.mxu1 %v3158_v32  ;;  %v3179_v30 = vld [vmem:[#allocation4 + $0x230] sm:$0xff]   ;;  %v3181_v32 = vld [vmem:[#allocation4 + $0x268] sm:$0xff]  }
 0x11d   :  { %v3180_v31 = vld [vmem:[#allocation4 + $0x2b0] sm:$0xff]  }
 0x11f   :  { %2979 = vmatpush3.bf16.msra.mxu0 %v3159_v33  ;;  %3001 = vmatpush3.bf16.msra.mxu1 %v3160_v34  ;;  %v3182_v33 = vld [vmem:[#allocation4 + $0x2e8] sm:$0xff]  }
 0x120   :  { %v1029_v42 = vpop.f32.mrf.mxu0  ;;  %2980 = vmatprep.subr.bf16.mxu0 %v3161_v35  ;;  %v1072_v51 = vpop.f32.mrf.mxu1  ;;  %3002 = vmatprep.subr.bf16.mxu1 %v3162_v38  ;;  %v3183_v34 = vld [vmem:[#allocation4 + $0x228] sm:$0xff]   ;;  %v3185_v38 = vld [vmem:[#allocation4 + $0x260] sm:$0xff]  }
 0x121   :  { %v1073_v62 = vadd.f32 %v1072_v51, %v210_v50  ;;  %v1030_v4 = vadd.f32 %v1029_v42, %v202_v54  ;;  %v3184_v35 = vld [vmem:[#allocation4 + $0x2a8] sm:$0xff]   ;;  %v3187_v42 = vld [vmem:[#allocation4 + $0x220] sm:$0xff]   ;;  %v3191_v51 = vld [vmem:[#allocation4 + $0x218] sm:$0xff]  }
 0x122   :  { %v1031_v55 = vpop.f32.mrf.mxu0  ;;  %v1074_v57 = vpop.f32.mrf.mxu1 }
 0x123   :  { %2981 = vmatpush3.bf16.msra.mxu0 %v3163_v41  ;;  %3003 = vmatpush3.bf16.msra.mxu1 %v3164_v48  ;;  %v1032_v63 = vadd.f32 %v1031_v55, %v206_v52  ;;  %v1075_v5 = vadd.f32 %v1074_v57, %v214_v56  ;;  %v1259_v15 = vmax.f32 %v1073_v62, 0.0  ;;  %v1257_v20 = vmax.f32 %v1030_v4, 0.0  ;;  %v3186_v41 = vld [vmem:[#allocation4 + $0x2e0] sm:$0xff]   ;;  %v3389_v55 = vld [vmem:[%s3426_s2 + $0x8] sm:$0xff] }
 0x124   :  { %v1033_v59 = vpop.f32.mrf.mxu0  ;;  %2982 = vmatprep.subr.bf16.mxu0 %v3165_v49  ;;  %v1076_v2 = vpop.f32.mrf.mxu1  ;;  %3004 = vmatprep.subr.bf16.mxu1 %v3166_v53  ;;  %v3188_v48 = vld [vmem:[#allocation4 + $0x2a0] sm:$0xff]   ;;  %v3189_v49 = vld [vmem:[#allocation4 + $0x258] sm:$0xff]   ;;  %v3193_v53 = vld [vmem:[#allocation4 + $0x250] sm:$0xff]   ;;  %v222_v62 = vrot.slane %v3389_v55, %v189_v0 }
 0x125   :  { %v1034_v1 = vadd.f32 %v1033_v59, %v202_v54  ;;  %v1077_v6 = vadd.f32 %v1076_v2, %v210_v50  ;;  %v1258_v16 = vmax.f32 %v1032_v63, 0.0  ;;  %v1260_v21 = vmax.f32 %v1075_v5, 0.0  ;;  %v3190_v50 = vld [vmem:[#allocation4 + $0x2d8] sm:$0xff]   ;;  %v3194_v54 = vld [vmem:[#allocation4 + $0x2d0] sm:$0xff]   ;;  %v3197_v59 = vld [vmem:[#allocation4 + $0x248] sm:$0xff]  }
 0x126   :  { %v1035_v7 = vpop.f32.mrf.mxu0  ;;  %v1078_v45 = vpop.f32.mrf.mxu1  ;;  %v3198_v63 = vld [vmem:[#allocation4 + $0x2c8] sm:$0xff]  }
 0x127   :  { %v1036_v8 = vadd.f32 %v1035_v7, %v206_v52  ;;  %2983 = vmatpush3.bf16.msra.mxu0 %v3167_v58  ;;  %v1273_v11 = vmax.f32 %v1034_v1, 0.0  ;;  %v1079_v12 = vadd.f32 %v1078_v45, %v214_v56  ;;  %3005 = vmatpush3.bf16.msra.mxu1 %v3168_v60  ;;  %v1275_v17 = vmax.f32 %v1077_v6, 0.0  ;;  %v3192_v52 = vld [vmem:[#allocation4 + $0x298] sm:$0xff]   ;;  %v3195_v56 = vld [vmem:[#allocation4 + $0x210] sm:$0xff]   ;;  %v3199_v5 = vld [vmem:[#allocation4 + $0x208] sm:$0xff]  }
 0x128   :  { %2984 = vmatprep.subr.bf16.mxu0 %v3169_v61  ;;  %3006 = vmatprep.subr.bf16.mxu1 %v3170_v3  ;;  %v3196_v58 = vld [vmem:[#allocation4 + $0x290] sm:$0xff]   ;;  %v226_v60 = vrot.slane %v3389_v55, %v193_v44  ;;  %v218_v1 = vrot.slane %v3389_v55, %v185_v46  ;;  %v230_v3 = vrot.slane %v3389_v55, %v197_v47  ;;  %v3200_v6 = vld [vmem:[#allocation4 + $0x288] sm:$0xff]   ;;  %v3201_v7 = vld [vmem:[#allocation4 + $0x240] sm:$0xff]  }
 0x129   :  { %v1274_v18 = vmax.f32 %v1036_v8, 0.0  ;;  %v1276_v10 = vmax.f32 %v1079_v12, 0.0  ;;  %v1289_v24 = vpack.c.bf16 %v1273_v11, %v1257_v20  ;;  %v1291_v28 = vpack.c.bf16 %v1275_v17, %v1259_v15  ;;  %v3202_v11 = vld [vmem:[#allocation4 + $0x2c0] sm:$0xff]   ;;  %v3205_v20 = vld [vmem:[#allocation4 + $0x378] sm:$0xff]  }
 0x12b   :  { %v1290_v22 = vpack.c.bf16 %v1274_v18, %v1258_v16  ;;  %2985 = vmatpush3.bf16.msra.mxu0 %v3171_v9  ;;  %v1292_v25 = vpack.c.bf16 %v1276_v10, %v1260_v21  ;;  %3007 = vmatpush3.bf16.msra.mxu1 %v3172_v13  ;;  %v3203_v16 = vld [vmem:[#allocation4 + $0x200] sm:$0xff]  }
 0x12c   :  { %3014 = vmatprep.subr.bf16.mxu0 %v3173_v14  ;;  %3036 = vmatprep.subr.bf16.mxu1 %v3174_v19  ;;  %v3204_v19 = vld [vmem:[#allocation4 + $0x280] sm:$0xff]  }
 0x12d   :  { %2446 = vmatprep.mubr.bf16.mxu0 %v1290_v22  ;;  %2487 = vmatprep.mubr.bf16.mxu1 %v1292_v25 }
 0x12e   :  { %2447 = vmatmul.mubr.bf16.vlgmr.msra.gmra.mxu0 %v1289_v24  ;;  %2488 = vmatmul.mubr.bf16.vlgmr.msra.gmra.mxu1 %v1291_v28  ;;  %v3206_v24 = vld [vmem:[#allocation4 + $0x3f8] sm:$0xff]  }
 0x12f   :  { %3015 = vmatpush3.bf16.msra.mxu0 %v3175_v23  ;;  %3037 = vmatpush3.bf16.msra.mxu1 %v3176_v26 }
 0x130   :  { %3016 = vmatprep.subr.bf16.mxu0 %v3177_v27  ;;  %3038 = vmatprep.subr.bf16.mxu1 %v3178_v29  ;;  %v3207_v29 = vld [vmem:[#allocation4 + $0x338] sm:$0xff]  }
 0x133   :  { %3017 = vmatpush3.bf16.msra.mxu0 %v3179_v30  ;;  %3039 = vmatpush3.bf16.msra.mxu1 %v3180_v31 }
 0x134   :  { %3018 = vmatprep.subr.bf16.mxu0 %v3181_v32  ;;  %3040 = vmatprep.subr.bf16.mxu1 %v3182_v33  ;;  %v3208_v32 = vld [vmem:[#allocation4 + $0x3b8] sm:$0xff]   ;;  %v3209_v33 = vld [vmem:[#allocation4 + $0x370] sm:$0xff]  }
 0x137   :  { %3019 = vmatpush3.bf16.msra.mxu0 %v3183_v34  ;;  %3041 = vmatpush3.bf16.msra.mxu1 %v3184_v35  ;;  %v3210_v35 = vld [vmem:[#allocation4 + $0x3f0] sm:$0xff]  }
 0x138   :  { %3020 = vmatprep.subr.bf16.mxu0 %v3185_v38  ;;  %3042 = vmatprep.subr.bf16.mxu1 %v3186_v41  ;;  %v3211_v38 = vld [vmem:[#allocation4 + $0x330] sm:$0xff]  }
 0x139   :  { %v3212_v41 = vld [vmem:[#allocation4 + $0x3b0] sm:$0xff]  }
 0x13b   :  { %3021 = vmatpush3.bf16.msra.mxu0 %v3187_v42  ;;  %3043 = vmatpush3.bf16.msra.mxu1 %v3188_v48  ;;  %v3213_v42 = vld [vmem:[#allocation4 + $0x368] sm:$0xff]  }
 0x13c   :  { %3022 = vmatprep.subr.bf16.mxu0 %v3189_v49  ;;  %3044 = vmatprep.subr.bf16.mxu1 %v3190_v50  ;;  %v3214_v48 = vld [vmem:[#allocation4 + $0x3e8] sm:$0xff]  }
 0x13d   :  { %v3215_v49 = vld [vmem:[#allocation4 + $0x328] sm:$0xff]  }
 0x13e   :  { %v3216_v50 = vld [vmem:[#allocation4 + $0x3a8] sm:$0xff]  }
 0x13f   :  { %3023 = vmatpush3.bf16.msra.mxu0 %v3191_v51  ;;  %3045 = vmatpush3.bf16.msra.mxu1 %v3192_v52  ;;  %v3217_v51 = vld [vmem:[#allocation4 + $0x360] sm:$0xff]  }
 0x140   :  { %v1115_v57 = vpop.f32.mrf.mxu0  ;;  %3024 = vmatprep.subr.bf16.mxu0 %v3193_v53  ;;  %v1158_v61 = vpop.f32.mrf.mxu1  ;;  %3046 = vmatprep.subr.bf16.mxu1 %v3194_v54  ;;  %v3218_v52 = vld [vmem:[#allocation4 + $0x3e0] sm:$0xff]  }
 0x141   :  { %v1159_v0 = vadd.f32 %v1158_v61, %v226_v60  ;;  %v1116_v46 = vadd.f32 %v1115_v57, %v218_v1  ;;  %v3219_v53 = vld [vmem:[#allocation4 + $0x320] sm:$0xff]   ;;  %v3222_v57 = vld [vmem:[#allocation4 + $0x3d8] sm:$0xff]   ;;  %v3226_v61 = vld [vmem:[#allocation4 + $0x3d0] sm:$0xff]  }
 0x142   :  { %v1117_v2 = vpop.f32.mrf.mxu0  ;;  %v1160_v4 = vpop.f32.mrf.mxu1  ;;  %v3220_v54 = vld [vmem:[#allocation4 + $0x3a0] sm:$0xff]  }
 0x143   :  { %3025 = vmatpush3.bf16.msra.mxu0 %v3195_v56  ;;  %3047 = vmatpush3.bf16.msra.mxu1 %v3196_v58  ;;  %v1118_v8 = vadd.f32 %v1117_v2, %v222_v62  ;;  %v1161_v12 = vadd.f32 %v1160_v4, %v230_v3  ;;  %v1263_v21 = vmax.f32 %v1159_v0, 0.0  ;;  %v1261_v25 = vmax.f32 %v1116_v46, 0.0  ;;  %v3221_v56 = vld [vmem:[#allocation4 + $0x358] sm:$0xff]   ;;  %v3229_v2 = vld [vmem:[#allocation4 + $0x348] sm:$0xff]  }
 0x144   :  { %v1119_v44 = vpop.f32.mrf.mxu0  ;;  %3026 = vmatprep.subr.bf16.mxu0 %v3197_v59  ;;  %v1162_v9 = vpop.f32.mrf.mxu1  ;;  %3048 = vmatprep.subr.bf16.mxu1 %v3198_v63  ;;  %v3223_v58 = vld [vmem:[#allocation4 + $0x318] sm:$0xff]   ;;  %v238_v4 = vrot.slane %v3389_v55, %v205_v37  ;;  %v242_v0 = vrot.slane %v3389_v55, %v209_v36 }
 0x145   :  { %v1120_v45 = vadd.f32 %v1119_v44, %v218_v1  ;;  %v1163_v13 = vadd.f32 %v1162_v9, %v226_v60  ;;  %v1262_v10 = vmax.f32 %v1118_v8, 0.0  ;;  %v1264_v26 = vmax.f32 %v1161_v12, 0.0  ;;  %v3224_v59 = vld [vmem:[#allocation4 + $0x398] sm:$0xff]   ;;  %v3225_v60 = vld [vmem:[#allocation4 + $0x350] sm:$0xff]   ;;  %v3232_v9 = vld [vmem:[#allocation4 + $0x388] sm:$0xff]  }
 0x146   :  { %v1121_v14 = vpop.f32.mrf.mxu0  ;;  %v1164_v47 = vpop.f32.mrf.mxu1  ;;  %v3228_v1 = vld [vmem:[#allocation4 + $0x390] sm:$0xff]   ;;  %v234_v44 = vrot.slane %v3389_v55, %v201_v39 }
 0x147   :  { %v1122_v15 = vadd.f32 %v1121_v14, %v222_v62  ;;  %3027 = vmatpush3.bf16.msra.mxu0 %v3199_v5  ;;  %v1277_v17 = vmax.f32 %v1120_v45, 0.0  ;;  %v1165_v18 = vadd.f32 %v1164_v47, %v230_v3  ;;  %3049 = vmatpush3.bf16.msra.mxu1 %v3200_v6  ;;  %v1279_v22 = vmax.f32 %v1163_v13, 0.0  ;;  %v3227_v62 = vld [vmem:[#allocation4 + $0x310] sm:$0xff]   ;;  %v3230_v5 = vld [vmem:[#allocation4 + $0x3c8] sm:$0xff]   ;;  %v3234_v13 = vld [vmem:[#allocation4 + $0x3c0] sm:$0xff]  }
 0x148   :  { %3028 = vmatprep.subr.bf16.mxu0 %v3201_v7  ;;  %3050 = vmatprep.subr.bf16.mxu1 %v3202_v11  ;;  %v246_v7 = vrot.slane %v3389_v55, %v213_v40  ;;  %v3231_v45 = vld [vmem:[#allocation4 + $0x308] sm:$0xff]   ;;  %v3233_v11 = vld [vmem:[#allocation4 + $0x340] sm:$0xff]  }
 0x149   :  { %v1278_v23 = vmax.f32 %v1122_v15, 0.0  ;;  %v1280_v27 = vmax.f32 %v1165_v18, 0.0  ;;  %v1293_v30 = vpack.c.bf16 %v1277_v17, %v1261_v25  ;;  %v1295_v34 = vpack.c.bf16 %v1279_v22, %v1263_v21  ;;  %v3235_v55 = vld [vmem:[#allocation4 + $0x300] sm:$0xff]  }
 0x14b   :  { %v1294_v28 = vpack.c.bf16 %v1278_v23, %v1262_v10  ;;  %3029 = vmatpush3.bf16.msra.mxu0 %v3203_v16  ;;  %v1296_v31 = vpack.c.bf16 %v1280_v27, %v1264_v26  ;;  %3051 = vmatpush3.bf16.msra.mxu1 %v3204_v19  ;;  %v3236_v19 = vld [vmem:[#allocation4 + $0x380] sm:$0xff]  }
 0x14c   :  { %3058 = vmatprep.subr.bf16.mxu0 %v3205_v20  ;;  %3080 = vmatprep.subr.bf16.mxu1 %v3206_v24 }
 0x14d   :  { %2528 = vmatprep.mubr.bf16.mxu0 %v1294_v28  ;;  %2569 = vmatprep.mubr.bf16.mxu1 %v1296_v31 }
 0x14e   :  { %2529 = vmatmul.mubr.bf16.vlgmr.msra.gmra.mxu0 %v1293_v30  ;;  %2570 = vmatmul.mubr.bf16.vlgmr.msra.gmra.mxu1 %v1295_v34 }
 0x14f   :  { %3059 = vmatpush3.bf16.msra.mxu0 %v3207_v29  ;;  %3081 = vmatpush3.bf16.msra.mxu1 %v3208_v32 }
 0x150   :  { %3060 = vmatprep.subr.bf16.mxu0 %v3209_v33  ;;  %3082 = vmatprep.subr.bf16.mxu1 %v3210_v35 }
 0x153   :  { %3061 = vmatpush3.bf16.msra.mxu0 %v3211_v38  ;;  %3083 = vmatpush3.bf16.msra.mxu1 %v3212_v41 }
 0x154   :  { %3062 = vmatprep.subr.bf16.mxu0 %v3213_v42  ;;  %3084 = vmatprep.subr.bf16.mxu1 %v3214_v48 }
 0x157   :  { %3063 = vmatpush3.bf16.msra.mxu0 %v3215_v49  ;;  %3085 = vmatpush3.bf16.msra.mxu1 %v3216_v50 }
 0x158   :  { %3064 = vmatprep.subr.bf16.mxu0 %v3217_v51  ;;  %3086 = vmatprep.subr.bf16.mxu1 %v3218_v52 }
 0x15b   :  { %3065 = vmatpush3.bf16.msra.mxu0 %v3219_v53  ;;  %3087 = vmatpush3.bf16.msra.mxu1 %v3220_v54 }
 0x15c   :  { %3066 = vmatprep.subr.bf16.mxu0 %v3221_v56  ;;  %3088 = vmatprep.subr.bf16.mxu1 %v3222_v57  ;;  %v2797_v56 = vld [vmem:[%s3428_s4] ss:$0 sm:$0xff] }
 0x15f   :  { %3067 = vmatpush3.bf16.msra.mxu0 %v3223_v58  ;;  %3089 = vmatpush3.bf16.msra.mxu1 %v3224_v59 }
 0x160   :  { %v1201_v63 = vpop.f32.mrf.mxu0  ;;  %3068 = vmatprep.subr.bf16.mxu0 %v3225_v60  ;;  %v1244_v3 = vpop.f32.mrf.mxu1  ;;  %3090 = vmatprep.subr.bf16.mxu1 %v3226_v61 }
 0x161   :  { %v1202_v14 = vadd.f32 %v1201_v63, %v234_v44  ;;  %v1245_v43 = vadd.f32 %v1244_v3, %v242_v0 }
 0x162   :  { %v1203_v6 = vpop.f32.mrf.mxu0  ;;  %v1246_v8 = vpop.f32.mrf.mxu1 }
 0x163   :  { %3069 = vmatpush3.bf16.msra.mxu0 %v3227_v62  ;;  %3091 = vmatpush3.bf16.msra.mxu1 %v3228_v1  ;;  %v1204_v46 = vadd.f32 %v1203_v6, %v238_v4  ;;  %v1247_v15 = vadd.f32 %v1246_v8, %v246_v7  ;;  %v1265_v22 = vmax.f32 %v1202_v14, 0.0  ;;  %v1267_v25 = vmax.f32 %v1245_v43, 0.0 }
 0x164   :  { %v1205_v37 = vpop.f32.mrf.mxu0  ;;  %3070 = vmatprep.subr.bf16.mxu0 %v3229_v2  ;;  %v1248_v39 = vpop.f32.mrf.mxu1  ;;  %3092 = vmatprep.subr.bf16.mxu1 %v3230_v5 }
 0x165   :  { %v1206_v12 = vadd.f32 %v1205_v37, %v234_v44  ;;  %v1249_v40 = vadd.f32 %v1248_v39, %v242_v0  ;;  %v1266_v20 = vmax.f32 %v1204_v46, 0.0  ;;  %v1268_v23 = vmax.f32 %v1247_v15, 0.0 }
 0x166   :  { %v1207_v47 = vpop.f32.mrf.mxu0  ;;  %v1250_v36 = vpop.f32.mrf.mxu1 }
 0x167   :  { %v1208_v16 = vadd.f32 %v1207_v47, %v238_v4  ;;  %3071 = vmatpush3.bf16.msra.mxu0 %v3231_v45  ;;  %v1281_v17 = vmax.f32 %v1206_v12, 0.0  ;;  %v1251_v18 = vadd.f32 %v1250_v36, %v246_v7  ;;  %3093 = vmatpush3.bf16.msra.mxu1 %v3232_v9  ;;  %v1283_v21 = vmax.f32 %v1249_v40, 0.0 }
 0x168   :  { %3072 = vmatprep.subr.bf16.mxu0 %v3233_v11  ;;  %3094 = vmatprep.subr.bf16.mxu1 %v3234_v13 }
 0x169   :  { %v1282_v10 = vmax.f32 %v1208_v16, 0.0  ;;  %v1284_v24 = vmax.f32 %v1251_v18, 0.0  ;;  %v1297_v27 = vpack.c.bf16 %v1281_v17, %v1265_v22  ;;  %v1299_v29 = vpack.c.bf16 %v1283_v21, %v1267_v25 }
 0x16b   :  { %v1298_v26 = vpack.c.bf16 %v1282_v10, %v1266_v20  ;;  %3073 = vmatpush3.bf16.msra.mxu0 %v3235_v55  ;;  %v1300_v28 = vpack.c.bf16 %v1284_v24, %v1268_v23  ;;  %3095 = vmatpush3.bf16.msra.mxu1 %v3236_v19 }
 0x16d   :  { %2610 = vmatprep.mubr.bf16.mxu0 %v1298_v26  ;;  %2651 = vmatprep.mubr.bf16.mxu1 %v1300_v28 }
 0x16e   :  { %2611 = vmatmul.mubr.bf16.vlgmr.msra.gmra.mxu0 %v1297_v27  ;;  %2652 = vmatmul.mubr.bf16.vlgmr.msra.gmra.mxu1 %v1299_v29 }
 0x1ce   :  { %v2942_v30 = vpop.f32.mrf.mxu0  ;;  %v2964_v31 = vpop.f32.mrf.mxu1 }
 0x1d0   :  { %v2943_v32 = vpop.f32.mrf.mxu0  ;;  %v2965_v33 = vpop.f32.mrf.mxu1 }
 0x1d1   :  { %v2944_v54 = vadd.f32 %v2943_v32, %v2942_v30  ;;  %v2966_v63 = vadd.f32 %v2965_v33, %v2964_v31 }
 0x1d2   :  { %v2945_v34 = vpop.f32.mrf.mxu0  ;;  %v2967_v35 = vpop.f32.mrf.mxu1 }
 0x1d3   :  { %v2367_v59 = vadd.f32 %v2944_v54, %v2797_v56 }
 0x1d4   :  { %v2946_v38 = vpop.f32.mrf.mxu0  ;;  %v2968_v42 = vpop.f32.mrf.mxu1 }
 0x1d5   :  { %v2947_v60 = vadd.f32 %v2946_v38, %v2945_v34  ;;  %v2408_v2 = vadd.f32 %v2966_v63, %v2367_v59  ;;  %v2969_v44 = vadd.f32 %v2968_v42, %v2967_v35 }
 0x1d7   :  { %v2370_v3 = vadd.f32 %v2947_v60, %v2797_v56 }
 0x1d9   :  { %v2411_v0 = vadd.f32 %v2969_v44, %v2370_v3 }
 0x1ee   :  { %v2986_v41 = vpop.f32.mrf.mxu0  ;;  %v3008_v48 = vpop.f32.mrf.mxu1 }
 0x1f0   :  { %v2987_v49 = vpop.f32.mrf.mxu0  ;;  %v3009_v50 = vpop.f32.mrf.mxu1 }
 0x1f1   :  { %v2988_v1 = vadd.f32 %v2987_v49, %v2986_v41  ;;  %v3010_v8 = vadd.f32 %v3009_v50, %v3008_v48 }
 0x1f2   :  { %v2989_v51 = vpop.f32.mrf.mxu0  ;;  %v3011_v52 = vpop.f32.mrf.mxu1 }
 0x1f3   :  { %v2449_v6 = vadd.f32 %v2988_v1, %v2408_v2 }
 0x1f4   :  { %v2990_v53 = vpop.f32.mrf.mxu0  ;;  %v3012_v58 = vpop.f32.mrf.mxu1 }
 0x1f5   :  { %v2991_v7 = vadd.f32 %v2990_v53, %v2989_v51  ;;  %v2490_v11 = vadd.f32 %v3010_v8, %v2449_v6  ;;  %v3013_v12 = vadd.f32 %v3012_v58, %v3011_v52 }
 0x1f7   :  { %v2452_v46 = vadd.f32 %v2991_v7, %v2411_v0 }
 0x1f9   :  { %v2493_v40 = vadd.f32 %v3013_v12, %v2452_v46 }
 0x20e   :  { %v3030_v57 = vpop.f32.mrf.mxu0  ;;  %v3052_v61 = vpop.f32.mrf.mxu1 }
 0x210   :  { %v3031_v62 = vpop.f32.mrf.mxu0  ;;  %v3053_v4 = vpop.f32.mrf.mxu1 }
 0x211   :  { %v3032_v45 = vadd.f32 %v3031_v62, %v3030_v57  ;;  %v3054_v47 = vadd.f32 %v3053_v4, %v3052_v61 }
 0x212   :  { %v3033_v5 = vpop.f32.mrf.mxu0  ;;  %v3055_v37 = vpop.f32.mrf.mxu1 }
 0x213   :  { %v2531_v39 = vadd.f32 %v3032_v45, %v2490_v11 }
 0x214   :  { %v3034_v9 = vpop.f32.mrf.mxu0  ;;  %v3056_v14 = vpop.f32.mrf.mxu1 }
 0x215   :  { %v3035_v13 = vadd.f32 %v3034_v9, %v3033_v5  ;;  %v2572_v36 = vadd.f32 %v3054_v47, %v2531_v39  ;;  %v3057_v20 = vadd.f32 %v3056_v14, %v3055_v37 }
 0x217   :  { %v2534_v55 = vadd.f32 %v3035_v13, %v2493_v40 }
 0x219   :  { %v2575_v24 = vadd.f32 %v3057_v20, %v2534_v55 }
 0x22e   :  { %v3074_v15 = vpop.f32.mrf.mxu0  ;;  %v3096_v43 = vpop.f32.mrf.mxu1 }
 0x230   :  { %v3075_v16 = vpop.f32.mrf.mxu0  ;;  %v3097_v18 = vpop.f32.mrf.mxu1 }
 0x231   :  { %v3076_v17 = vadd.f32 %v3075_v16, %v3074_v15  ;;  %v3098_v10 = vadd.f32 %v3097_v18, %v3096_v43 }
 0x232   :  { %v3077_v19 = vpop.f32.mrf.mxu0  ;;  %v3099_v22 = vpop.f32.mrf.mxu1 }
 0x233   :  { %v2613_v21 = vadd.f32 %v3076_v17, %v2572_v36 }
 0x234   :  { %v3078_v23 = vpop.f32.mrf.mxu0  ;;  %v3100_v27 = vpop.f32.mrf.mxu1 }
 0x235   :  { %v2654_v25 = vadd.f32 %v3098_v10, %v2613_v21  ;;  %v3079_v26 = vadd.f32 %v3078_v23, %v3077_v19  ;;  %v3101_v29 = vadd.f32 %v3100_v27, %v3099_v22 }
 0x237   :  { %2660 = vst [vmem:[%s3429_s5] sm:$0xff] %v2654_v25  ;;  %v2616_v28 = vadd.f32 %v3079_v26, %v2575_v24 }
 0x239   :  { %v2657_v30 = vadd.f32 %v3101_v29, %v2616_v28 }
 0x23b   :  { %2661 = vst [vmem:[%s3429_s5 + $0x8] sm:$0xff] %v2657_v30 }
 0x23c   :  { %2666 = vsyncpa [#allocation3], 1 }
 0x23d   :  { %2667 = vsyncpa [#allocation5], 1 }

</bundles_post_ra>
